<compile_context>
chip_gen: v7x
topology: tpu7x:2x2x1
jax: 0.10.0
libtpu: 0.0.40
codegen_flags: <defaults>
</compile_context>

<pallas_src>
import jax
import jax.numpy as jnp
from jax import lax
from jax.experimental import pallas as pl
from jax.experimental.pallas import tpu as pltpu

D = 128  # attention_dim == GRU input/hidden size (fixed at 128 by the module)


def _round_up(x, m):
    return ((x + m - 1) // m) * m


def _vmem_budget():
    """Chip-aware (max_rows, vmem_limit_bytes); v7x has 64 MiB/TC vs 128 MiB on v5e/v6e."""
    cap = 64 * 1024 * 1024  # conservative default: v7x per-TensorCore VMEM
    try:
        info = pltpu.get_tpu_info()
        cap_q = getattr(info, "vmem_capacity_bytes", None)
        if cap_q:
            cap = int(cap_q)
    except Exception:
        pass
    if cap <= 64 * 1024 * 1024:
        # v7x-class: double-buffered x (2 x 4 MiB) + the padded (Bb*T,1) score
        # transient stay well under 64 MiB; leave compiler-scratch headroom.
        return 8 * 1024, 32 * 1024 * 1024
    # v5e/v6e-class (128 MiB): bigger streaming blocks, fewer grid steps.
    return 32 * 1024, 96 * 1024 * 1024


def attention_kernel(x_ref, h_ref, w_ref, wihT_ref, whhT_ref, bih_ref, bhh_ref, out_ref):
    # x_ref   : (Bb, T, D)   input_padded block
    # h_ref   : (Bb, D)      GRU hidden block (h_0)
    # w_ref   : (D, D)       attention linear weight (PyTorch layout: (out, in))
    # wihT_ref: (D, 3D)      GRU weight_ih_l0, pre-transposed
    # whhT_ref: (D, 3D)      GRU weight_hh_l0, pre-transposed
    # bih_ref : (1, 3D)      GRU bias_ih_l0
    # bhh_ref : (1, 3D)      GRU bias_hh_l0
    # out_ref : (Bb, 2D)     [aux_context | context]
    x = x_ref[...]                                                           # (Bb, T, D)
    h = h_ref[...]                                                           # (Bb, D)

    # Score projection: v = h @ W  (single MXU matmul per block).
    v = jnp.dot(h, w_ref[...], preferred_element_type=jnp.float32)          # (Bb, D)

    # Score reduce on the MXU: per-batch (T,D)@(D,1)  ->  e_{bt} = sum_d x_{btd} v_{bd}
    e = lax.dot_general(
        x, v[:, :, None],
        dimension_numbers=(((2,), (1,)), ((0,), (0,))),
        preferred_element_type=jnp.float32,
    )[:, :, 0]                                                               # (Bb, T)

    # Softmax over the sequence axis T (lane axis here).  Exact reciprocal.
    e_max = jnp.max(e, axis=-1, keepdims=True)                               # (Bb, 1)
    p = jnp.exp(e - e_max)                                                   # (Bb, T)  EUP
    alpha = p / jnp.sum(p, axis=-1, keepdims=True)                           # (Bb, T)

    # Context reduce on the MXU: per-batch (1,T)@(T,D) -> sum_t alpha_{bt} x_{btd}.
    context = lax.dot_general(
        alpha[:, None, :], x,
        dimension_numbers=(((2,), (1,)), ((0,), (0,))),
        preferred_element_type=jnp.float32,
    )[:, 0, :]                                                               # (Bb, D)

    # Single GRU cell step for the whole block (PyTorch gate order: r, z, n).
    gi = jnp.dot(context, wihT_ref[...], preferred_element_type=jnp.float32) + bih_ref[...]  # (Bb, 3D)
    gh = jnp.dot(h, whhT_ref[...], preferred_element_type=jnp.float32) + bhh_ref[...]        # (Bb, 3D)
    r = jax.nn.sigmoid(gi[:, 0 * D:1 * D] + gh[:, 0 * D:1 * D])
    z = jax.nn.sigmoid(gi[:, 1 * D:2 * D] + gh[:, 1 * D:2 * D])
    n = jnp.tanh(gi[:, 2 * D:3 * D] + r * gh[:, 2 * D:3 * D])
    h_new = (1.0 - z) * n + z * h                                            # (Bb, D)  aux_context

    # Two lane-aligned direct stores instead of a concatenate.
    out_ref[:, 0:D] = h_new.astype(out_ref.dtype)
    out_ref[:, D:2 * D] = context.astype(out_ref.dtype)


def attention_forward(input_padded, hidden, w, w_ih, w_hh, b_ih, b_hh, block_b=128):
    """input_padded: (B, T, D); hidden: (1, B, D). Returns (B, 2*D)."""
    B, T, d = input_padded.shape
    assert d == D and hidden.shape == (1, B, D)

    h0 = hidden[0]                                   # (B, D)
    wihT = jnp.transpose(w_ih)                       # (D, 3D)
    whhT = jnp.transpose(w_hh)                       # (D, 3D)
    bih2 = b_ih.reshape(1, 3 * D)
    bhh2 = b_hh.reshape(1, 3 * D)

    max_rows, vmem_limit = _vmem_budget()

    # Sublane-aligned batch block, capped so the x slab fits the per-chip VMEM budget.
    bb_cap = max(8, (max_rows // max(T, 1)) // 8 * 8)
    Bb = min(block_b, bb_cap, _round_up(B, 8))
    # Guarantee >= 2 grid steps when the batch allows it, so the "parallel" axis can
    # split across both TensorCores on v7x.
    if B > 8:
        Bb = min(Bb, _round_up(pl.cdiv(B, 2), 8))
    Bb = max(8, Bb)
    B_pad = _round_up(B, Bb)

    x = input_padded
    if B_pad != B:
        x = jnp.pad(x, ((0, B_pad - B), (0, 0), (0, 0)))
        h0 = jnp.pad(h0, ((0, B_pad - B), (0, 0)))

    out = pl.pallas_call(
        attention_kernel,
        out_shape=jax.ShapeDtypeStruct((B_pad, 2 * D), jnp.float32),
        grid_spec=pltpu.PrefetchScalarGridSpec(
            num_scalar_prefetch=0,
            grid=(B_pad // Bb,),
            in_specs=[
                pl.BlockSpec((Bb, T, D), lambda b: (b, 0, 0)),   # x block (streamed)
                pl.BlockSpec((Bb, D), lambda b: (b, 0)),         # h block
                pl.BlockSpec((D, D), lambda b: (0, 0)),          # W (attention linear)
                pl.BlockSpec((D, 3 * D), lambda b: (0, 0)),      # W_ih^T
                pl.BlockSpec((D, 3 * D), lambda b: (0, 0)),      # W_hh^T
                pl.BlockSpec((1, 3 * D), lambda b: (0, 0)),      # b_ih
                pl.BlockSpec((1, 3 * D), lambda b: (0, 0)),      # b_hh
            ],
            out_specs=pl.BlockSpec((Bb, 2 * D), lambda b: (b, 0)),
        ),
        compiler_params=pltpu.CompilerParams(
            dimension_semantics=("parallel",),       # batch-block axis: shard across TCs
            vmem_limit_bytes=vmem_limit,
        ),
    )(x, h0, w, wihT, whhT, bih2, bhh2)
    return out[:B]                                   # (B, 2D)


def attention_reference(x, hidden, w, w_ih, w_hh, b_ih, b_hh):
    """Pure-JAX mirror of the PyTorch forward, for validation."""
    h0 = hidden[0]                                            # (B, D)
    xw = jnp.einsum("btd,ed->bte", x, w)                      # Linear (no bias)
    e = jnp.einsum("bte,be->bt", xw, h0)[..., None]           # (B, T, 1)
    alpha = jax.nn.softmax(e, axis=1)
    context = jnp.einsum("btd,bt->bd", x, alpha[..., 0])      # (B, D)
    gi = context @ w_ih.T + b_ih
    gh = h0 @ w_hh.T + b_hh
    r = jax.nn.sigmoid(gi[:, :D] + gh[:, :D])
    z = jax.nn.sigmoid(gi[:, D:2 * D] + gh[:, D:2 * D])
    n = jnp.tanh(gi[:, 2 * D:] + r * gh[:, 2 * D:])
    h_new = (1.0 - z) * n + z * h0
    return jnp.concatenate([h_new, context], axis=-1)         # (B, 2D)


if __name__ == "__main__":
    B, T = 2, 8
    key = jax.random.PRNGKey(0)
    k = jax.random.split(key, 7)

    # Deterministic synthetic parameters (shapes from the module's __init__).
    scale = 0.05
    x = jax.random.normal(k[0], (B, T, D), jnp.float32)              # input_padded
    hidden = jax.random.normal(k[1], (1, B, D), jnp.float32)         # GRU hidden h_0
    w = scale * jax.random.normal(k[2], (D, D), jnp.float32)         # nn.Linear(D, D, bias=False)
    w_ih = scale * jax.random.normal(k[3], (3 * D, D), jnp.float32)  # GRU weight_ih_l0
    w_hh = scale * jax.random.normal(k[4], (3 * D, D), jnp.float32)  # GRU weight_hh_l0
    b_ih = scale * jax.random.normal(k[5], (3 * D,), jnp.float32)    # GRU bias_ih_l0
    b_hh = scale * jax.random.normal(k[6], (3 * D,), jnp.float32)    # GRU bias_hh_l0

    out = attention_forward(x, hidden, w, w_ih, w_hh, b_ih, b_hh)
    out = jax.block_until_ready(out)
    assert out.shape == (B, 2 * D), out.shape

    ref = attention_reference(x, hidden, w, w_ih, w_hh, b_ih, b_hh)
    assert jnp.allclose(out, ref, rtol=1e-3, atol=1e-3), float(jnp.max(jnp.abs(out - ref)))

    print("KERNEL_OK")
</pallas_src>

<mosaic_0001>
module attributes {stable_mosaic.version = 11 : i64} {
  func.func @attention_kernel(%arg0: i32, %arg1: memref<8x8x128xf32, #tpu.memory_space<vmem>>, %arg2: memref<8x128xf32, #tpu.memory_space<vmem>>, %arg3: memref<128x128xf32, #tpu.memory_space<vmem>>, %arg4: memref<128x384xf32, #tpu.memory_space<vmem>>, %arg5: memref<128x384xf32, #tpu.memory_space<vmem>>, %arg6: memref<1x384xf32, #tpu.memory_space<vmem>>, %arg7: memref<1x384xf32, #tpu.memory_space<vmem>>, %arg8: memref<8x256xf32, #tpu.memory_space<vmem>>) attributes {dimension_semantics = [#tpu.dimension_semantics<parallel>], iteration_bounds = array<i64: 1>, scalar_prefetch = 0 : i64, scratch_operands = 0 : i64, tpu.core_type = #tpu.core_type<tc>, window_params = [{transform_indices = @transform_0, window_bounds = array<i64: 8, 8, 128>}, {transform_indices = @transform_1, window_bounds = array<i64: 8, 128>}, {pipeline_mode = #tpu.pipeline_mode<synchronous>, transform_indices = @transform_2, window_bounds = array<i64: 128, 128>}, {pipeline_mode = #tpu.pipeline_mode<synchronous>, transform_indices = @transform_3, window_bounds = array<i64: 128, 384>}, {pipeline_mode = #tpu.pipeline_mode<synchronous>, transform_indices = @transform_4, window_bounds = array<i64: 128, 384>}, {pipeline_mode = #tpu.pipeline_mode<synchronous>, transform_indices = @transform_5, window_bounds = array<i64: 1, 384>}, {pipeline_mode = #tpu.pipeline_mode<synchronous>, transform_indices = @transform_6, window_bounds = array<i64: 1, 384>}, {transform_indices = @transform_7, window_bounds = array<i64: 8, 256>}]} {
    %c0 = arith.constant 0 : index
    %c0_0 = arith.constant 0 : index
    %c0_1 = arith.constant 0 : index
    %0 = vector.load %arg1[%c0, %c0_0, %c0_1] : memref<8x8x128xf32, #tpu.memory_space<vmem>>, vector<8x8x128xf32>
    %c0_2 = arith.constant 0 : index
    %c0_3 = arith.constant 0 : index
    %1 = vector.load %arg2[%c0_2, %c0_3] : memref<8x128xf32, #tpu.memory_space<vmem>>, vector<8x128xf32>
    %c0_4 = arith.constant 0 : index
    %c0_5 = arith.constant 0 : index
    %2 = vector.load %arg3[%c0_4, %c0_5] : memref<128x128xf32, #tpu.memory_space<vmem>>, vector<128x128xf32>
    %cst = arith.constant dense<0.000000e+00> : vector<8x128xf32>
    %3 = tpu.matmul %1, %2, %cst {dimension_numbers = #tpu.dot_dimension_numbers<[1], [0], [0], [1], [0, 0, 1, 1], [], []>} : vector<8x128xf32>, vector<128x128xf32>, vector<8x128xf32> -> vector<8x128xf32>
    %4 = vector.shape_cast %3 : vector<8x128xf32> to vector<8x128x1xf32>
    %cst_6 = arith.constant dense<0.000000e+00> : vector<8x8x1xf32>
    %5 = tpu.matmul %0, %4, %cst_6 {dimension_numbers = #tpu.dot_dimension_numbers<[2], [1], [1], [2], [0, 0, 0, 1, 1, 2], [0], [0]>} : vector<8x8x128xf32>, vector<8x128x1xf32>, vector<8x8x1xf32> -> vector<8x8x1xf32>
    %6 = vector.shape_cast %5 : vector<8x8x1xf32> to vector<8x8xf32>
    %cst_7 = arith.constant dense<0xFF800000> : vector<8xf32>
    %7 = vector.multi_reduction <maximumf>, %6, %cst_7 [1] : vector<8x8xf32> to vector<8xf32>
    %8 = vector.shape_cast %7 : vector<8xf32> to vector<8x1xf32>
    %9 = vector.broadcast %8 : vector<8x1xf32> to vector<8x8xf32>
    %10 = arith.subf %6, %9 : vector<8x8xf32>
    %11 = math.exp %10 : vector<8x8xf32>
    %cst_8 = arith.constant dense<0.000000e+00> : vector<8xf32>
    %12 = vector.multi_reduction <add>, %11, %cst_8 [1] : vector<8x8xf32> to vector<8xf32>
    %13 = vector.shape_cast %12 : vector<8xf32> to vector<8x1xf32>
    %14 = vector.broadcast %13 : vector<8x1xf32> to vector<8x8xf32>
    %15 = arith.divf %11, %14 : vector<8x8xf32>
    %16 = vector.shape_cast %15 : vector<8x8xf32> to vector<8x1x8xf32>
    %cst_9 = arith.constant dense<0.000000e+00> : vector<8x1x128xf32>
    %17 = tpu.matmul %16, %0, %cst_9 {dimension_numbers = #tpu.dot_dimension_numbers<[2], [1], [1], [2], [0, 0, 0, 1, 1, 2], [0], [0]>} : vector<8x1x8xf32>, vector<8x8x128xf32>, vector<8x1x128xf32> -> vector<8x1x128xf32>
    %18 = vector.shape_cast %17 : vector<8x1x128xf32> to vector<8x128xf32>
    %c0_10 = arith.constant 0 : index
    %c0_11 = arith.constant 0 : index
    %19 = vector.load %arg4[%c0_10, %c0_11] : memref<128x384xf32, #tpu.memory_space<vmem>>, vector<128x384xf32>
    %cst_12 = arith.constant dense<0.000000e+00> : vector<8x384xf32>
    %20 = tpu.matmul %18, %19, %cst_12 {dimension_numbers = #tpu.dot_dimension_numbers<[1], [0], [0], [1], [0, 0, 1, 1], [], []>} : vector<8x128xf32>, vector<128x384xf32>, vector<8x384xf32> -> vector<8x384xf32>
    %c0_13 = arith.constant 0 : index
    %c0_14 = arith.constant 0 : index
    %21 = vector.load %arg6[%c0_13, %c0_14] : memref<1x384xf32, #tpu.memory_space<vmem>>, vector<1x384xf32>
    %22 = vector.broadcast %21 : vector<1x384xf32> to vector<8x384xf32>
    %23 = arith.addf %20, %22 : vector<8x384xf32>
    %c0_15 = arith.constant 0 : index
    %c0_16 = arith.constant 0 : index
    %24 = vector.load %arg5[%c0_15, %c0_16] : memref<128x384xf32, #tpu.memory_space<vmem>>, vector<128x384xf32>
    %cst_17 = arith.constant dense<0.000000e+00> : vector<8x384xf32>
    %25 = tpu.matmul %1, %24, %cst_17 {dimension_numbers = #tpu.dot_dimension_numbers<[1], [0], [0], [1], [0, 0, 1, 1], [], []>} : vector<8x128xf32>, vector<128x384xf32>, vector<8x384xf32> -> vector<8x384xf32>
    %c0_18 = arith.constant 0 : index
    %c0_19 = arith.constant 0 : index
    %26 = vector.load %arg7[%c0_18, %c0_19] : memref<1x384xf32, #tpu.memory_space<vmem>>, vector<1x384xf32>
    %27 = vector.broadcast %26 : vector<1x384xf32> to vector<8x384xf32>
    %28 = arith.addf %25, %27 : vector<8x384xf32>
    %29 = vector.extract_strided_slice %23 {offsets = [0, 0], sizes = [8, 128], strides = [1, 1]} : vector<8x384xf32> to vector<8x128xf32>
    %30 = vector.extract_strided_slice %28 {offsets = [0, 0], sizes = [8, 128], strides = [1, 1]} : vector<8x384xf32> to vector<8x128xf32>
    %31 = arith.addf %29, %30 : vector<8x128xf32>
    %32 = arith.negf %31 : vector<8x128xf32>
    %33 = math.exp %32 : vector<8x128xf32>
    %cst_20 = arith.constant 1.000000e+00 : f32
    %34 = vector.broadcast %cst_20 : f32 to vector<8x128xf32>
    %35 = arith.addf %34, %33 : vector<8x128xf32>
    %36 = arith.divf %34, %35 : vector<8x128xf32>
    %37 = vector.extract_strided_slice %23 {offsets = [0, 128], sizes = [8, 128], strides = [1, 1]} : vector<8x384xf32> to vector<8x128xf32>
    %38 = vector.extract_strided_slice %28 {offsets = [0, 128], sizes = [8, 128], strides = [1, 1]} : vector<8x384xf32> to vector<8x128xf32>
    %39 = arith.addf %37, %38 : vector<8x128xf32>
    %40 = arith.negf %39 : vector<8x128xf32>
    %41 = math.exp %40 : vector<8x128xf32>
    %cst_21 = arith.constant 1.000000e+00 : f32
    %42 = vector.broadcast %cst_21 : f32 to vector<8x128xf32>
    %43 = arith.addf %42, %41 : vector<8x128xf32>
    %44 = arith.divf %42, %43 : vector<8x128xf32>
    %45 = vector.extract_strided_slice %23 {offsets = [0, 256], sizes = [8, 128], strides = [1, 1]} : vector<8x384xf32> to vector<8x128xf32>
    %46 = vector.extract_strided_slice %28 {offsets = [0, 256], sizes = [8, 128], strides = [1, 1]} : vector<8x384xf32> to vector<8x128xf32>
    %47 = arith.mulf %36, %46 : vector<8x128xf32>
    %48 = arith.addf %45, %47 : vector<8x128xf32>
    %49 = math.tanh %48 : vector<8x128xf32>
    %cst_22 = arith.constant 1.000000e+00 : f32
    %50 = vector.broadcast %cst_22 : f32 to vector<8x128xf32>
    %51 = arith.subf %50, %44 : vector<8x128xf32>
    %52 = arith.mulf %51, %49 : vector<8x128xf32>
    %53 = arith.mulf %44, %1 : vector<8x128xf32>
    %54 = arith.addf %52, %53 : vector<8x128xf32>
    %c0_23 = arith.constant 0 : index
    %c0_24 = arith.constant 0 : index
    %55 = vector.load %arg8[%c0_23, %c0_24] : memref<8x256xf32, #tpu.memory_space<vmem>>, vector<8x128xf32>
    tpu.vector_store %arg8[%c0_23, %c0_24], %54 {strides = array<i32>} : memref<8x256xf32, #tpu.memory_space<vmem>>, vector<8x128xf32>,
    %c0_25 = arith.constant 0 : index
    %c128 = arith.constant 128 : index
    %56 = vector.load %arg8[%c0_25, %c128] : memref<8x256xf32, #tpu.memory_space<vmem>>, vector<8x128xf32>
    tpu.vector_store %arg8[%c0_25, %c128], %18 {strides = array<i32>} : memref<8x256xf32, #tpu.memory_space<vmem>>, vector<8x128xf32>,
    return
  }
  func.func @transform_0(%arg0: i32) -> (i32, i32, i32) {
    %c0_i32 = arith.constant 0 : i32
    %c0_i32_0 = arith.constant 0 : i32
    %c0_i32_1 = arith.constant 0 : i32
    return %arg0, %c0_i32, %c0_i32_0 : i32, i32, i32
  }
  func.func @transform_1(%arg0: i32) -> (i32, i32) {
    %c0_i32 = arith.constant 0 : i32
    %c0_i32_0 = arith.constant 0 : i32
    return %arg0, %c0_i32 : i32, i32
  }
  func.func @transform_2(%arg0: i32) -> (i32, i32) {
    %c0_i32 = arith.constant 0 : i32
    %c0_i32_0 = arith.constant 0 : i32
    %c0_i32_1 = arith.constant 0 : i32
    return %c0_i32, %c0_i32_0 : i32, i32
  }
  func.func @transform_3(%arg0: i32) -> (i32, i32) {
    %c0_i32 = arith.constant 0 : i32
    %c0_i32_0 = arith.constant 0 : i32
    %c0_i32_1 = arith.constant 0 : i32
    return %c0_i32, %c0_i32_0 : i32, i32
  }
  func.func @transform_4(%arg0: i32) -> (i32, i32) {
    %c0_i32 = arith.constant 0 : i32
    %c0_i32_0 = arith.constant 0 : i32
    %c0_i32_1 = arith.constant 0 : i32
    return %c0_i32, %c0_i32_0 : i32, i32
  }
  func.func @transform_5(%arg0: i32) -> (i32, i32) {
    %c0_i32 = arith.constant 0 : i32
    %c0_i32_0 = arith.constant 0 : i32
    %c0_i32_1 = arith.constant 0 : i32
    return %c0_i32, %c0_i32_0 : i32, i32
  }
  func.func @transform_6(%arg0: i32) -> (i32, i32) {
    %c0_i32 = arith.constant 0 : i32
    %c0_i32_0 = arith.constant 0 : i32
    %c0_i32_1 = arith.constant 0 : i32
    return %c0_i32, %c0_i32_0 : i32, i32
  }
  func.func @transform_7(%arg0: i32) -> (i32, i32) {
    %c0_i32 = arith.constant 0 : i32
    %c0_i32_0 = arith.constant 0 : i32
    return %arg0, %c0_i32 : i32, i32
  }
}

</mosaic_0001>

<bundles_post_ra>
// kernel: tpu_custom_call.1
= control target key start
LH: loop header
LB: loop body
LE: loop exit
PB: predicated region body
PF: predicated region fallthrough
CT: control target
= control target key end

     0   :  { %12 = vsyncpa [#allocation3], 0  ;;  %s4401_s0 = inlined_call_operand.hbm [shape: f32[8,8,128], index: 0, kind: input, shape index: {}]   ;;  %s4402_s1 = inlined_call_operand.hbm [shape: f32[8,128], index: 1, kind: input, shape index: {}]   ;;  %s4403_s2 = inlined_call_operand.hbm [shape: f32[128,128], index: 2, kind: input, shape index: {}]   ;;  %s4404_s3 = inlined_call_operand.hbm [shape: f32[128,384], index: 3, kind: input, shape index: {}]   ;;  %s4405_s4 = inlined_call_operand.hbm [shape: f32[128,384], index: 4, kind: input, shape index: {}]   ;;  %s4406_s5 = inlined_call_operand.vmem [shape: f32[1,384], index: 5, kind: input, shape index: {}]   ;;  %s4407_s6 = inlined_call_operand.vmem [shape: f32[1,384], index: 6, kind: input, shape index: {}]   ;;  %s4408_s7 = inlined_call_operand.hbm [shape: f32[8,256], index: 7, kind: output, shape index: {}]  }
   0x1   :  { %13 = vsyncpa [#allocation6], 0 }
   0x2   :  { %14 = vsyncpa [#allocation9], 0 }
   0x3   :  { %15 = vsyncpa [#allocation4], 0  ;;  %s3852_s24 = smov [#allocation5]   ;;  %s3853_s26 = smov [#allocation8]  }
   0x4   :  { %s34_s25 = sshll.u32 %s3852_s24, 4  ;;  %s55_s27 = sshll.u32 %s3853_s26, 4  ;;  %s35_s25 = int_to_ptr.vmem [resolvable:$true] %s34_s25  ;;  %s3906_s27 = int_to_ptr.vmem [resolvable:$true] %s55_s27 }
   0x5   :  { %s3712_s30 = scalar_lea.hbm %s4402_s1, 128 }
   0x6   :  { %p3713_p0 = scmp.ne.s32.totalorder %s4402_s1, %s3712_s30  ;;  %p3716_p1 = scmp.lt.u32.totalorder %s3712_s30, %s4402_s1 }
   0x8   :  { %p3718_p2 = pnand %p3716_p1, %p3713_p0 }
   0xa   :  { %3721 = shalt.err (!%p3718_p2)
}
   0xb   :  { %s3722_s12 = scalar_lea.vmem %s35_s25, 128  ;;  %p3727_p4 = scmp.lt.s32.totalorder %s35_s25, %s35_s25 }
   0xc   :  { %p3723_p3 = scmp.ne.s32.totalorder %s35_s25, %s3722_s12  ;;  %p3728_p5 = scmp.lt.s32.totalorder %s3722_s12, %s3722_s12 }
   0xe   :  { %p3729_p6 = por %p3728_p5, %p3727_p4 }
  0x10   :  { %p3730_p7 = pnand %p3729_p6, %p3723_p3 }
  0x12   :  { %3733 = shalt.err (!%p3730_p7)
}
  0x13   :  { %37 = dma.hbm_to_vmem [thread:$0]  %s4402_s1, 128, %s35_s25, [#allocation6]  }
  0x14   :  { %s3734_s17 = scalar_lea.hbm %s4404_s3, 6144 }
  0x15   :  { %p3735_p8 = scmp.ne.s32.totalorder %s4404_s3, %s3734_s17  ;;  %p3738_p9 = scmp.lt.u32.totalorder %s3734_s17, %s4404_s3 }
  0x17   :  { %p3740_p10 = pnand %p3738_p9, %p3735_p8 }
  0x19   :  { %3743 = shalt.err (!%p3740_p10)
}
  0x1a   :  { %s3744_s22 = scalar_lea.vmem %s3906_s27, 6144  ;;  %p3749_p12 = scmp.lt.s32.totalorder %s3906_s27, %s3906_s27 }
  0x1b   :  { %p3745_p11 = scmp.ne.s32.totalorder %s3906_s27, %s3744_s22  ;;  %p3750_p13 = scmp.lt.s32.totalorder %s3744_s22, %s3744_s22 }
  0x1d   :  { %p3751_p0 = por %p3750_p13, %p3749_p12 }
  0x1f   :  { %p3752_p1 = pnand %p3751_p0, %p3745_p11 }
  0x21   :  { %3755 = shalt.err (!%p3752_p1)
}
  0x22   :  { %s3854_s1 = smov 384   ;;  %s3855_s23 = smov 24  }
  0x23   :  { %61 = dma.hbm_to_vmem [thread:$0]  %s4404_s3, 6144, %s3906_s27, [#allocation9], %s3854_s1, %s3854_s1, %s3855_s23  }
  0x24   :  { %s3856_s26 = smov [#allocation2]   ;;  %s3756_s8 = scalar_lea.hbm %s4401_s0, 1024 }
  0x25   :  { %s21_s28 = sshll.u32 %s3856_s26, 4  ;;  %p3757_p2 = scmp.ne.s32.totalorder %s4401_s0, %s3756_s8  ;;  %s22_s28 = int_to_ptr.vmem [resolvable:$true] %s21_s28 }
  0x26   :  { %p3760_p3 = scmp.lt.u32.totalorder %s3756_s8, %s4401_s0 }
  0x28   :  { %p3762_p4 = pnand %p3760_p3, %p3757_p2 }
  0x2a   :  { %3765 = shalt.err (!%p3762_p4)
}
  0x2b   :  { %s3766_s13 = scalar_lea.vmem %s22_s28, 1024  ;;  %p3771_p6 = scmp.lt.s32.totalorder %s22_s28, %s22_s28 }
  0x2c   :  { %p3767_p5 = scmp.ne.s32.totalorder %s22_s28, %s3766_s13  ;;  %p3772_p7 = scmp.lt.s32.totalorder %s3766_s13, %s3766_s13 }
  0x2e   :  { %p3773_p8 = por %p3772_p7, %p3771_p6 }
  0x30   :  { %p3774_p9 = pnand %p3773_p8, %p3767_p5 }
  0x32   :  { %3777 = shalt.err (!%p3774_p9)
}
  0x33   :  { %s3857_s3 = smov 128   ;;  %s3858_s27 = smov 8  }
  0x34   :  { %27 = dma.hbm_to_vmem [thread:$0]  %s4401_s0, 1024, %s22_s28, [#allocation3], %s3857_s3, %s3857_s3, %s3858_s27  }
  0x35   :  { %s3859_s16 = smov [#allocation7]   ;;  %s3860_s18 = smov [#allocation10]  }
  0x36   :  { %s43_s17 = sshll.u32 %s3859_s16, 4  ;;  %s67_s19 = sshll.u32 %s3860_s18, 4  ;;  %s44_s17 = int_to_ptr.vmem [resolvable:$true] %s43_s17  ;;  %s68_s19 = int_to_ptr.vmem [resolvable:$true] %s67_s19 }
  0x37   :  { %s3778_s22 = scalar_lea.hbm %s4403_s2, 2048 }
  0x38   :  { %p3779_p10 = scmp.ne.s32.totalorder %s4403_s2, %s3778_s22  ;;  %p3782_p11 = scmp.lt.u32.totalorder %s3778_s22, %s4403_s2 }
  0x3a   :  { %p3784_p12 = pnand %p3782_p11, %p3779_p10 }
  0x3c   :  { %3787 = shalt.err (!%p3784_p12)
}
  0x3d   :  { %s3788_s0 = scalar_lea.vmem %s44_s17, 2048  ;;  %p3793_p0 = scmp.lt.s32.totalorder %s44_s17, %s44_s17 }
  0x3e   :  { %p3789_p13 = scmp.ne.s32.totalorder %s44_s17, %s3788_s0  ;;  %p3794_p1 = scmp.lt.s32.totalorder %s3788_s0, %s3788_s0 }
  0x40   :  { %p3795_p2 = por %p3794_p1, %p3793_p0 }
  0x42   :  { %p3796_p3 = pnand %p3795_p2, %p3789_p13 }
  0x44   :  { %3799 = shalt.err (!%p3796_p3)
}
  0x45   :  { %49 = dma.hbm_to_vmem [thread:$0]  %s4403_s2, 2048, %s44_s17, [#allocation6], %s3857_s3, %s3857_s3, %s3858_s27  }
  0x46   :  { %s3800_s10 = scalar_lea.hbm %s4405_s4, 6144 }
  0x47   :  { %p3801_p4 = scmp.ne.s32.totalorder %s4405_s4, %s3800_s10  ;;  %p3804_p5 = scmp.lt.u32.totalorder %s3800_s10, %s4405_s4 }
  0x49   :  { %p3806_p6 = pnand %p3804_p5, %p3801_p4 }
  0x4b   :  { %3809 = shalt.err (!%p3806_p6)
}
  0x4c   :  { %s3810_s15 = scalar_lea.vmem %s68_s19, 6144  ;;  %p3815_p8 = scmp.lt.s32.totalorder %s68_s19, %s68_s19 }
  0x4d   :  { %p3811_p7 = scmp.ne.s32.totalorder %s68_s19, %s3810_s15  ;;  %p3816_p9 = scmp.lt.s32.totalorder %s3810_s15, %s3810_s15 }
  0x4f   :  { %p3817_p10 = por %p3816_p9, %p3815_p8 }
  0x51   :  { %p3818_p11 = pnand %p3817_p10, %p3811_p7 }
  0x53   :  { %3821 = shalt.err (!%p3818_p11)
}
  0x54   :  { %73 = dma.hbm_to_vmem [thread:$0]  %s4405_s4, 6144, %s68_s19, [#allocation9], %s3854_s1, %s3854_s1, %s3855_s23  }
  0x55   :  { %3844 = dma.done.wait [#allocation3], 1024  }
  0x56   :  { %3845 = vsyncadd [#allocation3], 4294966272 }
  0x57   :  { %3846 = dma.done.wait [#allocation6], 2176  }
  0x58   :  { %3847 = vsyncadd [#allocation6], 4294965120 }
  0x59   :  { %3848 = dma.done.wait [#allocation9], 12288  }
  0x5a   :  { %3849 = vsyncadd [#allocation9], 4294955008  ;;  %v3861_v0 = vmov 0.0|0.0   ;;  %vm3862_vm0 = vmmov 0   ;;  %v3863_v1 = vmov 0.0   ;;  %v102_v2 = vld [vmem:[#allocation7] sm:$0xff]  ;;  %v188_v27 = vlaneseq }
  0x5b   :  { %3319 = vmatprep.subr.bf16.mxu0 %v3861_v0  ;;  %2926 = vmatprep.mubr.msk.f32.mxu0 %vm3862_vm0, %v3863_v1  ;;  %v103_v3 = vld [vmem:[#allocation7 + $0x8] sm:$0xff]  ;;  %v104_v4 = vld [vmem:[#allocation7 + $0x10] sm:$0xff]  ;;  %v105_v6 = vld [vmem:[#allocation7 + $0x18] sm:$0xff]  ;;  %vm1350_vm1 = vcmask 1041409   ;;  %vm1352_vm2 = vcmask 1042434   ;;  %vm1354_vm3 = vcmask 1043459  }
  0x5c   :  { %3343 = vmatprep.subr.bf16.mxu1 %v3861_v0  ;;  %2961 = vmatprep.mubr.msk.f32.mxu1 %vm3862_vm0, %v3863_v1  ;;  %v3320_v5 = vpack.c.bf16 %v103_v3, %v102_v2  ;;  %v3323_v7 = vpack.c.bf16 %v105_v6, %v104_v4  ;;  %v106_v8 = vld [vmem:[#allocation7 + $0x20] sm:$0xff]  ;;  %v107_v9 = vld [vmem:[#allocation7 + $0x28] sm:$0xff]  ;;  %v108_v11 = vld [vmem:[#allocation7 + $0x30] sm:$0xff]  ;;  %v3995_v28 = vshrl.u32 %v188_v27, 7  ;;  %v1317_v29 = vand.u32 127, %v188_v27 }
  0x5d   :  { %v3326_v10 = vpack.c.bf16 %v107_v9, %v106_v8  ;;  %v109_v12 = vld [vmem:[#allocation7 + $0x38] sm:$0xff]  ;;  %v110_v14 = vld [vmem:[#allocation7 + $0x40] sm:$0xff]  ;;  %v111_v15 = vld [vmem:[#allocation7 + $0x48] sm:$0xff]  ;;  %vm1356_vm4 = vcmask 1044484   ;;  %vm1358_vm5 = vcmask 1045509   ;;  %vm1360_vm6 = vcmask 1046534  }
  0x5e   :  { %3321 = vmatpush3.bf16.msra.mxu0 %v3320_v5  ;;  %v3329_v13 = vpack.c.bf16 %v109_v12, %v108_v11  ;;  %v3332_v16 = vpack.c.bf16 %v111_v15, %v110_v14  ;;  %v112_v17 = vld [vmem:[#allocation7 + $0x50] sm:$0xff]  ;;  %v113_v18 = vld [vmem:[#allocation7 + $0x58] sm:$0xff]  ;;  %v114_v20 = vld [vmem:[#allocation7 + $0x60] sm:$0xff]  ;;  %v3998_v30 = vsub.s32 %v1317_v29, %v3995_v28  ;;  %v4001_v31 = vsub.s32 0, %v3995_v28 }
  0x5f   :  { %3322 = vmatprep.subr.bf16.mxu0 %v3861_v0  ;;  %v3335_v19 = vpack.c.bf16 %v113_v18, %v112_v17  ;;  %v115_v21 = vld [vmem:[#allocation7 + $0x68] sm:$0xff]  ;;  %v116_v23 = vld [vmem:[#allocation7 + $0x70] sm:$0xff]  ;;  %v117_v24 = vld [vmem:[#allocation7 + $0x78] sm:$0xff]  ;;  %v4004_v32 = vsub.s32 1, %v3995_v28  ;;  %v4013_v37 = vsub.s32 2, %v3995_v28  ;;  %v4018_v39 = vsub.s32 3, %v3995_v28 }
  0x60   :  { %v3338_v22 = vpack.c.bf16 %v115_v21, %v114_v20  ;;  %v3341_v25 = vpack.c.bf16 %v117_v24, %v116_v23  ;;  %v101_v26 = vld [vmem:[#allocation5] sm:$0xff]  ;;  %v4023_v47 = vsub.s32 4, %v3995_v28  ;;  %v4032_v52 = vsub.s32 5, %v3995_v28 }
  0x61   :  { %vm1362_vm7 = vcmask 1047559   ;;  %vm1365_vm8 = vcmask 64512  }
  0x62   :  { %3324 = vmatpush3.bf16.msra.mxu0 %v3323_v7 }
  0x63   :  { %3325 = vmatprep.subr.bf16.mxu0 %v3861_v0 }
  0x66   :  { %3327 = vmatpush3.bf16.msra.mxu0 %v3326_v10 }
  0x67   :  { %3328 = vmatprep.subr.bf16.mxu0 %v3861_v0 }
  0x6a   :  { %3330 = vmatpush3.bf16.msra.mxu0 %v3329_v13 }
  0x6b   :  { %3331 = vmatprep.subr.bf16.mxu0 %v3861_v0 }
  0x6e   :  { %3333 = vmatpush3.bf16.msra.mxu0 %v3332_v16 }
  0x6f   :  { %3334 = vmatprep.subr.bf16.mxu0 %v3861_v0 }
  0x72   :  { %3336 = vmatpush3.bf16.msra.mxu0 %v3335_v19 }
  0x73   :  { %3337 = vmatprep.subr.bf16.mxu0 %v3861_v0 }
  0x76   :  { %3339 = vmatpush3.bf16.msra.mxu0 %v3338_v22 }
  0x77   :  { %3340 = vmatprep.subr.bf16.mxu0 %v3861_v0 }
  0x7a   :  { %3342 = vmatpush3.bf16.msra.mxu0 %v3341_v25 }
  0x7b   :  { %3367 = vmatprep.subr.bf16.mxu0 %v3861_v0 }
  0x7d   :  { %2927 = vmatmul.mubr.f32.vlgmr.msra.gmra.mrb[0].mxu0 %v101_v26 }
  0x7e   :  { %2996 = vmatprep.mubr.msk.f32.mxu0 %vm3862_vm0, %v3863_v1 }
 0x150   :  { %v4006_v33 = vpop.f32.mrb[0].mxu0 }
 0x151   :  { %v191_v34 = vrot.slane %v4006_v33, %v4001_v31  ;;  %v258_v35 = vrot.slane %v4006_v33, %v4004_v32  ;;  %v2928_v36 = vpop.f32.mrb[1].mxu0  ;;  %v325_v38 = vrot.slane %v4006_v33, %v4013_v37  ;;  %v392_v40 = vrot.slane %v4006_v33, %v4018_v39 }
 0x152   :  { %v4029_v51 = vrot.slane %v4006_v33, %v4023_v47  ;;  %v4039_v56 = vrot.slane %v4006_v33, %v4032_v52 }
 0x153   :  { %260 = vbcast.lane.b32.xlu1 %v258_v35, 256  ;;  %193 = vbcast.lane.b32.xlu0 %v191_v34, 256 }
 0x157   :  { %264 = vbcast.lane.b32.xlu1 %v258_v35, 264  ;;  %197 = vbcast.lane.b32.xlu0 %v191_v34, 264 }
 0x15b   :  { %205 = vbcast.lane.b32.xlu1 %v191_v34, 280  ;;  %201 = vbcast.lane.b32.xlu0 %v191_v34, 272 }
 0x15f   :  { %272 = vbcast.lane.b32.xlu1 %v258_v35, 280  ;;  %268 = vbcast.lane.b32.xlu0 %v258_v35, 272 }
 0x163   :  { %213 = vbcast.lane.b32.xlu1 %v191_v34, 296  ;;  %209 = vbcast.lane.b32.xlu0 %v191_v34, 288 }
 0x167   :  { %280 = vbcast.lane.b32.xlu1 %v258_v35, 296  ;;  %276 = vbcast.lane.b32.xlu0 %v258_v35, 288 }
 0x16b   :  { %221 = vbcast.lane.b32.xlu1 %v191_v34, 312  ;;  %217 = vbcast.lane.b32.xlu0 %v191_v34, 304 }
 0x16f   :  { %288 = vbcast.lane.b32.xlu1 %v258_v35, 312  ;;  %284 = vbcast.lane.b32.xlu0 %v258_v35, 304 }
 0x173   :  { %229 = vbcast.lane.b32.xlu1 %v191_v34, 328  ;;  %225 = vbcast.lane.b32.xlu0 %v191_v34, 320 }
 0x177   :  { %296 = vbcast.lane.b32.xlu1 %v258_v35, 328  ;;  %292 = vbcast.lane.b32.xlu0 %v258_v35, 320 }
 0x17b   :  { %237 = vbcast.lane.b32.xlu1 %v191_v34, 344  ;;  %233 = vbcast.lane.b32.xlu0 %v191_v34, 336 }
 0x17f   :  { %304 = vbcast.lane.b32.xlu1 %v258_v35, 344  ;;  %300 = vbcast.lane.b32.xlu0 %v258_v35, 336 }
 0x183   :  { %245 = vbcast.lane.b32.xlu1 %v191_v34, 360  ;;  %241 = vbcast.lane.b32.xlu0 %v191_v34, 352 }
 0x187   :  { %312 = vbcast.lane.b32.xlu1 %v258_v35, 360  ;;  %308 = vbcast.lane.b32.xlu0 %v258_v35, 352 }
 0x18b   :  { %253 = vbcast.lane.b32.xlu1 %v191_v34, 376  ;;  %249 = vbcast.lane.b32.xlu0 %v191_v34, 368 }
 0x18f   :  { %320 = vbcast.lane.b32.xlu1 %v258_v35, 376  ;;  %316 = vbcast.lane.b32.xlu0 %v258_v35, 368  ;;  %v4075_v35 = vld [vmem:[#allocation2] sm:$0xff] }
 0x193   :  { %331 = vbcast.lane.b32.xlu1 %v325_v38, 264  ;;  %327 = vbcast.lane.b32.xlu0 %v325_v38, 256 }
 0x197   :  { %398 = vbcast.lane.b32.xlu1 %v392_v40, 264  ;;  %394 = vbcast.lane.b32.xlu0 %v392_v40, 256 }
 0x19b   :  { %339 = vbcast.lane.b32.xlu1 %v325_v38, 280  ;;  %335 = vbcast.lane.b32.xlu0 %v325_v38, 272 }
 0x19f   :  { %406 = vbcast.lane.b32.xlu1 %v392_v40, 280  ;;  %402 = vbcast.lane.b32.xlu0 %v392_v40, 272 }
 0x1a3   :  { %347 = vbcast.lane.b32.xlu1 %v325_v38, 296  ;;  %343 = vbcast.lane.b32.xlu0 %v325_v38, 288 }
 0x1a7   :  { %414 = vbcast.lane.b32.xlu1 %v392_v40, 296  ;;  %410 = vbcast.lane.b32.xlu0 %v392_v40, 288 }
 0x1ab   :  { %355 = vbcast.lane.b32.xlu1 %v325_v38, 312  ;;  %351 = vbcast.lane.b32.xlu0 %v325_v38, 304 }
 0x1af   :  { %422 = vbcast.lane.b32.xlu1 %v392_v40, 312  ;;  %418 = vbcast.lane.b32.xlu0 %v392_v40, 304 }
 0x1b3   :  { %363 = vbcast.lane.b32.xlu1 %v325_v38, 328  ;;  %359 = vbcast.lane.b32.xlu0 %v325_v38, 320 }
 0x1b7   :  { %430 = vbcast.lane.b32.xlu1 %v392_v40, 328  ;;  %426 = vbcast.lane.b32.xlu0 %v392_v40, 320 }
 0x1bb   :  { %371 = vbcast.lane.b32.xlu1 %v325_v38, 344  ;;  %367 = vbcast.lane.b32.xlu0 %v325_v38, 336 }
 0x1bf   :  { %438 = vbcast.lane.b32.xlu1 %v392_v40, 344  ;;  %434 = vbcast.lane.b32.xlu0 %v392_v40, 336 }
 0x1c3   :  { %379 = vbcast.lane.b32.xlu1 %v325_v38, 360  ;;  %375 = vbcast.lane.b32.xlu0 %v325_v38, 352 }
 0x1c5   :  { %v261_v41 = vpop.permute.xlu1 %260  ;;  %v194_v42 = vpop.permute.xlu0 %193 }
 0x1c7   :  { %446 = vbcast.lane.b32.xlu1 %v392_v40, 360  ;;  %442 = vbcast.lane.b32.xlu0 %v392_v40, 352 }
 0x1c9   :  { %v265_v43 = vpop.permute.xlu1 %264  ;;  %v198_v44 = vpop.permute.xlu0 %197 }
 0x1ca   :  { %v3368_v45 = vpack.c.bf16 %v265_v43, %v261_v41  ;;  %v3344_v46 = vpack.c.bf16 %v198_v44, %v194_v42  ;;  %v4081_v41 = vld [vmem:[#allocation2 + $0x8] sm:$0xff] }
 0x1cb   :  { %387 = vbcast.lane.b32.xlu1 %v325_v38, 376  ;;  %383 = vbcast.lane.b32.xlu0 %v325_v38, 368 }
 0x1cc   :  { %3345 = vmatpush3.bf16.msra.mxu1 %v3344_v46  ;;  %3369 = vmatpush3.bf16.msra.mxu0 %v3368_v45  ;;  %v4094_v46 = vsub.s32 6, %v3995_v28 }
 0x1cd   :  { %v206_v48 = vpop.permute.xlu1 %205  ;;  %v202_v49 = vpop.permute.xlu0 %201  ;;  %3346 = vmatprep.subr.bf16.mxu1 %v3861_v0  ;;  %3370 = vmatprep.subr.bf16.mxu0 %v3861_v0 }
 0x1ce   :  { %v3347_v50 = vpack.c.bf16 %v206_v48, %v202_v49 }
 0x1cf   :  { %454 = vbcast.lane.b32.xlu1 %v392_v40, 376  ;;  %450 = vbcast.lane.b32.xlu0 %v392_v40, 368 }
 0x1d0   :  { %3348 = vmatpush3.bf16.msra.mxu1 %v3347_v50 }
 0x1d1   :  { %v273_v53 = vpop.permute.xlu1 %272  ;;  %v269_v54 = vpop.permute.xlu0 %268  ;;  %3349 = vmatprep.subr.bf16.mxu1 %v3861_v0 }
 0x1d2   :  { %v3371_v55 = vpack.c.bf16 %v273_v53, %v269_v54  ;;  %v4101_v53 = vrot.slane %v4006_v33, %v4094_v46 }
 0x1d3   :  { %465 = vbcast.lane.b32.xlu1 %v4029_v51, 264  ;;  %461 = vbcast.lane.b32.xlu0 %v4029_v51, 256 }
 0x1d4   :  { %3372 = vmatpush3.bf16.msra.mxu0 %v3371_v55 }
 0x1d5   :  { %v214_v57 = vpop.permute.xlu1 %213  ;;  %v210_v58 = vpop.permute.xlu0 %209  ;;  %3373 = vmatprep.subr.bf16.mxu0 %v3861_v0 }
 0x1d6   :  { %v3350_v59 = vpack.c.bf16 %v214_v57, %v210_v58 }
 0x1d7   :  { %532 = vbcast.lane.b32.xlu1 %v4039_v56, 264  ;;  %528 = vbcast.lane.b32.xlu0 %v4039_v56, 256 }
 0x1d8   :  { %3351 = vmatpush3.bf16.msra.mxu1 %v3350_v59 }
 0x1d9   :  { %v281_v60 = vpop.permute.xlu1 %280  ;;  %v277_v61 = vpop.permute.xlu0 %276  ;;  %3352 = vmatprep.subr.bf16.mxu1 %v3861_v0 }
 0x1da   :  { %v3374_v62 = vpack.c.bf16 %v281_v60, %v277_v61 }
 0x1db   :  { %473 = vbcast.lane.b32.xlu1 %v4029_v51, 280  ;;  %469 = vbcast.lane.b32.xlu0 %v4029_v51, 272 }
 0x1dc   :  { %3375 = vmatpush3.bf16.msra.mxu0 %v3374_v62 }
 0x1dd   :  { %v222_v63 = vpop.permute.xlu1 %221  ;;  %v218_v2 = vpop.permute.xlu0 %217  ;;  %3376 = vmatprep.subr.bf16.mxu0 %v3861_v0 }
 0x1de   :  { %v3353_v3 = vpack.c.bf16 %v222_v63, %v218_v2 }
 0x1df   :  { %540 = vbcast.lane.b32.xlu1 %v4039_v56, 280  ;;  %536 = vbcast.lane.b32.xlu0 %v4039_v56, 272 }
 0x1e0   :  { %3354 = vmatpush3.bf16.msra.mxu1 %v3353_v3 }
 0x1e1   :  { %v289_v4 = vpop.permute.xlu1 %288  ;;  %v285_v5 = vpop.permute.xlu0 %284  ;;  %3355 = vmatprep.subr.bf16.mxu1 %v3861_v0 }
 0x1e2   :  { %v3377_v6 = vpack.c.bf16 %v289_v4, %v285_v5 }
 0x1e3   :  { %481 = vbcast.lane.b32.xlu1 %v4029_v51, 296  ;;  %477 = vbcast.lane.b32.xlu0 %v4029_v51, 288 }
 0x1e4   :  { %3378 = vmatpush3.bf16.msra.mxu0 %v3377_v6 }
 0x1e5   :  { %v230_v7 = vpop.permute.xlu1 %229  ;;  %v226_v8 = vpop.permute.xlu0 %225  ;;  %3379 = vmatprep.subr.bf16.mxu0 %v3861_v0 }
 0x1e6   :  { %v3356_v9 = vpack.c.bf16 %v230_v7, %v226_v8 }
 0x1e7   :  { %548 = vbcast.lane.b32.xlu1 %v4039_v56, 296  ;;  %544 = vbcast.lane.b32.xlu0 %v4039_v56, 288 }
 0x1e8   :  { %3357 = vmatpush3.bf16.msra.mxu1 %v3356_v9 }
 0x1e9   :  { %v297_v10 = vpop.permute.xlu1 %296  ;;  %v293_v11 = vpop.permute.xlu0 %292  ;;  %3358 = vmatprep.subr.bf16.mxu1 %v3861_v0 }
 0x1ea   :  { %v3380_v12 = vpack.c.bf16 %v297_v10, %v293_v11 }
 0x1eb   :  { %489 = vbcast.lane.b32.xlu1 %v4029_v51, 312  ;;  %485 = vbcast.lane.b32.xlu0 %v4029_v51, 304 }
 0x1ec   :  { %3381 = vmatpush3.bf16.msra.mxu0 %v3380_v12 }
 0x1ed   :  { %v238_v13 = vpop.permute.xlu1 %237  ;;  %v234_v14 = vpop.permute.xlu0 %233  ;;  %3382 = vmatprep.subr.bf16.mxu0 %v3861_v0 }
 0x1ee   :  { %v3359_v15 = vpack.c.bf16 %v238_v13, %v234_v14 }
 0x1ef   :  { %556 = vbcast.lane.b32.xlu1 %v4039_v56, 312  ;;  %552 = vbcast.lane.b32.xlu0 %v4039_v56, 304 }
 0x1f0   :  { %3360 = vmatpush3.bf16.msra.mxu1 %v3359_v15 }
 0x1f1   :  { %v305_v16 = vpop.permute.xlu1 %304  ;;  %v301_v17 = vpop.permute.xlu0 %300  ;;  %3361 = vmatprep.subr.bf16.mxu1 %v3861_v0 }
 0x1f2   :  { %v3383_v18 = vpack.c.bf16 %v305_v16, %v301_v17 }
 0x1f3   :  { %497 = vbcast.lane.b32.xlu1 %v4029_v51, 328  ;;  %493 = vbcast.lane.b32.xlu0 %v4029_v51, 320 }
 0x1f4   :  { %3384 = vmatpush3.bf16.msra.mxu0 %v3383_v18 }
 0x1f5   :  { %v246_v19 = vpop.permute.xlu1 %245  ;;  %v242_v20 = vpop.permute.xlu0 %241  ;;  %3385 = vmatprep.subr.bf16.mxu0 %v3861_v0 }
 0x1f6   :  { %v3362_v21 = vpack.c.bf16 %v246_v19, %v242_v20 }
 0x1f7   :  { %564 = vbcast.lane.b32.xlu1 %v4039_v56, 328  ;;  %560 = vbcast.lane.b32.xlu0 %v4039_v56, 320 }
 0x1f8   :  { %3363 = vmatpush3.bf16.msra.mxu1 %v3362_v21 }
 0x1f9   :  { %v313_v22 = vpop.permute.xlu1 %312  ;;  %v309_v23 = vpop.permute.xlu0 %308  ;;  %3364 = vmatprep.subr.bf16.mxu1 %v3861_v0 }
 0x1fa   :  { %v3386_v24 = vpack.c.bf16 %v313_v22, %v309_v23 }
 0x1fb   :  { %505 = vbcast.lane.b32.xlu1 %v4029_v51, 344  ;;  %501 = vbcast.lane.b32.xlu0 %v4029_v51, 336 }
 0x1fc   :  { %3387 = vmatpush3.bf16.msra.mxu0 %v3386_v24 }
 0x1fd   :  { %v254_v25 = vpop.permute.xlu1 %253  ;;  %v250_v26 = vpop.permute.xlu0 %249  ;;  %3388 = vmatprep.subr.bf16.mxu0 %v3861_v0 }
 0x1fe   :  { %v3365_v27 = vpack.c.bf16 %v254_v25, %v250_v26 }
 0x1ff   :  { %572 = vbcast.lane.b32.xlu1 %v4039_v56, 344  ;;  %568 = vbcast.lane.b32.xlu0 %v4039_v56, 336 }
 0x200   :  { %3366 = vmatpush3.bf16.msra.mxu1 %v3365_v27 }
 0x201   :  { %v321_v29 = vpop.permute.xlu1 %320  ;;  %v317_v34 = vpop.permute.xlu0 %316  ;;  %3391 = vmatprep.subr.bf16.mxu1 %v3861_v0 }
 0x202   :  { %v3389_v36 = vpack.c.bf16 %v321_v29, %v317_v34  ;;  %v4147_v34 = vld [vmem:[#allocation2 + $0x10] sm:$0xff] }
 0x203   :  { %513 = vbcast.lane.b32.xlu1 %v4029_v51, 360  ;;  %509 = vbcast.lane.b32.xlu0 %v4029_v51, 352 }
 0x204   :  { %3390 = vmatpush3.bf16.msra.mxu0 %v3389_v36  ;;  %2962 = vmatmul.mubr.f32.vlgmr.msra.gmra.mrb[0].mxu1 %v4075_v35 }
 0x205   :  { %v332_v38 = vpop.permute.xlu1 %331  ;;  %v328_v40 = vpop.permute.xlu0 %327  ;;  %3415 = vmatprep.subr.bf16.mxu0 %v3861_v0  ;;  %3031 = vmatprep.mubr.msk.f32.mxu1 %vm3862_vm0, %v3863_v1 }
 0x206   :  { %v3392_v42 = vpack.c.bf16 %v332_v38, %v328_v40 }
 0x207   :  { %580 = vbcast.lane.b32.xlu1 %v4039_v56, 360  ;;  %576 = vbcast.lane.b32.xlu0 %v4039_v56, 352 }
 0x208   :  { %3393 = vmatpush3.bf16.msra.mxu1 %v3392_v42  ;;  %2997 = vmatmul.mubr.f32.vlgmr.msra.gmra.mrb[2].mxu0 %v4081_v41  ;;  %v4153_v42 = vld [vmem:[#allocation2 + $0x18] sm:$0xff] }
 0x209   :  { %v399_v43 = vpop.permute.xlu1 %398  ;;  %v395_v44 = vpop.permute.xlu0 %394  ;;  %3394 = vmatprep.subr.bf16.mxu1 %v3861_v0  ;;  %3066 = vmatprep.mubr.msk.f32.mxu0 %vm3862_vm0, %v3863_v1 }
 0x20a   :  { %v3416_v45 = vpack.c.bf16 %v399_v43, %v395_v44 }
 0x20b   :  { %521 = vbcast.lane.b32.xlu1 %v4029_v51, 376  ;;  %517 = vbcast.lane.b32.xlu0 %v4029_v51, 368  ;;  %v4104_v51 = vsub.s32 7, %v3995_v28 }
 0x20c   :  { %3417 = vmatpush3.bf16.msra.mxu0 %v3416_v45 }
 0x20d   :  { %v340_v48 = vpop.permute.xlu1 %339  ;;  %v336_v49 = vpop.permute.xlu0 %335  ;;  %3418 = vmatprep.subr.bf16.mxu0 %v3861_v0 }
 0x20e   :  { %v3395_v50 = vpack.c.bf16 %v340_v48, %v336_v49  ;;  %v3864_v49 = vmov 0  }
 0x20f   :  { %588 = vbcast.lane.b32.xlu1 %v4039_v56, 376  ;;  %584 = vbcast.lane.b32.xlu0 %v4039_v56, 368  ;;  %v4111_v56 = vrot.slane %v4006_v33, %v4104_v51 }
 0x210   :  { %3396 = vmatpush3.bf16.msra.mxu1 %v3395_v50  ;;  %3668 = vset.pattern.permute.xlu1 %v3864_v49 }
 0x211   :  { %v407_v54 = vpop.permute.xlu1 %406  ;;  %v403_v55 = vpop.permute.xlu0 %402  ;;  %3397 = vmatprep.subr.bf16.mxu1 %v3861_v0  ;;  %3667 = vset.pattern.permute.xlu0 %v3864_v49 }
 0x212   :  { %v3419_v57 = vpack.c.bf16 %v407_v54, %v403_v55 }
 0x213   :  { %599 = vbcast.lane.b32.xlu1 %v4101_v53, 264  ;;  %595 = vbcast.lane.b32.xlu0 %v4101_v53, 256 }
 0x214   :  { %3420 = vmatpush3.bf16.msra.mxu0 %v3419_v57 }
 0x215   :  { %v348_v58 = vpop.permute.xlu1 %347  ;;  %v344_v59 = vpop.permute.xlu0 %343  ;;  %3421 = vmatprep.subr.bf16.mxu0 %v3861_v0 }
 0x216   :  { %v3398_v28 = vpack.c.bf16 %v348_v58, %v344_v59 }
 0x217   :  { %666 = vbcast.lane.b32.xlu1 %v4111_v56, 264  ;;  %662 = vbcast.lane.b32.xlu0 %v4111_v56, 256 }
 0x218   :  { %3399 = vmatpush3.bf16.msra.mxu1 %v3398_v28 }
 0x219   :  { %v415_v60 = vpop.permute.xlu1 %414  ;;  %v411_v61 = vpop.permute.xlu0 %410  ;;  %3400 = vmatprep.subr.bf16.mxu1 %v3861_v0 }
 0x21a   :  { %v3422_v62 = vpack.c.bf16 %v415_v60, %v411_v61 }
 0x21b   :  { %607 = vbcast.lane.b32.xlu1 %v4101_v53, 280  ;;  %603 = vbcast.lane.b32.xlu0 %v4101_v53, 272 }
 0x21c   :  { %3423 = vmatpush3.bf16.msra.mxu0 %v3422_v62 }
 0x21d   :  { %v356_v33 = vpop.permute.xlu1 %355  ;;  %v352_v63 = vpop.permute.xlu0 %351  ;;  %3424 = vmatprep.subr.bf16.mxu0 %v3861_v0 }
 0x21e   :  { %v3401_v2 = vpack.c.bf16 %v356_v33, %v352_v63 }
 0x21f   :  { %674 = vbcast.lane.b32.xlu1 %v4111_v56, 280  ;;  %670 = vbcast.lane.b32.xlu0 %v4111_v56, 272 }
 0x220   :  { %3402 = vmatpush3.bf16.msra.mxu1 %v3401_v2 }
 0x221   :  { %v423_v3 = vpop.permute.xlu1 %422  ;;  %v419_v4 = vpop.permute.xlu0 %418  ;;  %3403 = vmatprep.subr.bf16.mxu1 %v3861_v0 }
 0x222   :  { %v3425_v5 = vpack.c.bf16 %v423_v3, %v419_v4 }
 0x223   :  { %615 = vbcast.lane.b32.xlu1 %v4101_v53, 296  ;;  %611 = vbcast.lane.b32.xlu0 %v4101_v53, 288 }
 0x224   :  { %3426 = vmatpush3.bf16.msra.mxu0 %v3425_v5 }
 0x225   :  { %v364_v6 = vpop.permute.xlu1 %363  ;;  %v360_v7 = vpop.permute.xlu0 %359  ;;  %3427 = vmatprep.subr.bf16.mxu0 %v3861_v0 }
 0x226   :  { %v3404_v8 = vpack.c.bf16 %v364_v6, %v360_v7 }
 0x227   :  { %682 = vbcast.lane.b32.xlu1 %v4111_v56, 296  ;;  %678 = vbcast.lane.b32.xlu0 %v4111_v56, 288 }
 0x228   :  { %3405 = vmatpush3.bf16.msra.mxu1 %v3404_v8 }
 0x229   :  { %v431_v9 = vpop.permute.xlu1 %430  ;;  %v427_v10 = vpop.permute.xlu0 %426  ;;  %3406 = vmatprep.subr.bf16.mxu1 %v3861_v0 }
 0x22a   :  { %v3428_v11 = vpack.c.bf16 %v431_v9, %v427_v10 }
 0x22b   :  { %623 = vbcast.lane.b32.xlu1 %v4101_v53, 312  ;;  %619 = vbcast.lane.b32.xlu0 %v4101_v53, 304 }
 0x22c   :  { %3429 = vmatpush3.bf16.msra.mxu0 %v3428_v11 }
 0x22d   :  { %v372_v12 = vpop.permute.xlu1 %371  ;;  %v368_v13 = vpop.permute.xlu0 %367  ;;  %3430 = vmatprep.subr.bf16.mxu0 %v3861_v0 }
 0x22e   :  { %v3407_v14 = vpack.c.bf16 %v372_v12, %v368_v13 }
 0x22f   :  { %690 = vbcast.lane.b32.xlu1 %v4111_v56, 312  ;;  %686 = vbcast.lane.b32.xlu0 %v4111_v56, 304 }
 0x230   :  { %3408 = vmatpush3.bf16.msra.mxu1 %v3407_v14 }
 0x231   :  { %v439_v15 = vpop.permute.xlu1 %438  ;;  %v435_v16 = vpop.permute.xlu0 %434  ;;  %3409 = vmatprep.subr.bf16.mxu1 %v3861_v0 }
 0x232   :  { %v3431_v17 = vpack.c.bf16 %v439_v15, %v435_v16 }
 0x233   :  { %631 = vbcast.lane.b32.xlu1 %v4101_v53, 328  ;;  %627 = vbcast.lane.b32.xlu0 %v4101_v53, 320 }
 0x234   :  { %3432 = vmatpush3.bf16.msra.mxu0 %v3431_v17 }
 0x235   :  { %v380_v18 = vpop.permute.xlu1 %379  ;;  %v376_v19 = vpop.permute.xlu0 %375  ;;  %3433 = vmatprep.subr.bf16.mxu0 %v3861_v0 }
 0x236   :  { %v3410_v20 = vpack.c.bf16 %v380_v18, %v376_v19 }
 0x237   :  { %698 = vbcast.lane.b32.xlu1 %v4111_v56, 328  ;;  %694 = vbcast.lane.b32.xlu0 %v4111_v56, 320 }
 0x238   :  { %3411 = vmatpush3.bf16.msra.mxu1 %v3410_v20 }
 0x239   :  { %v447_v21 = vpop.permute.xlu1 %446  ;;  %v443_v22 = vpop.permute.xlu0 %442  ;;  %3412 = vmatprep.subr.bf16.mxu1 %v3861_v0 }
 0x23a   :  { %v3434_v23 = vpack.c.bf16 %v447_v21, %v443_v22 }
 0x23b   :  { %639 = vbcast.lane.b32.xlu1 %v4101_v53, 344  ;;  %635 = vbcast.lane.b32.xlu0 %v4101_v53, 336 }
 0x23c   :  { %3435 = vmatpush3.bf16.msra.mxu0 %v3434_v23 }
 0x23d   :  { %v388_v24 = vpop.permute.xlu1 %387  ;;  %v384_v25 = vpop.permute.xlu0 %383  ;;  %3436 = vmatprep.subr.bf16.mxu0 %v3861_v0 }
 0x23e   :  { %v3413_v26 = vpack.c.bf16 %v388_v24, %v384_v25 }
 0x23f   :  { %706 = vbcast.lane.b32.xlu1 %v4111_v56, 344  ;;  %702 = vbcast.lane.b32.xlu0 %v4111_v56, 336 }
 0x240   :  { %3414 = vmatpush3.bf16.msra.mxu1 %v3413_v26 }
 0x241   :  { %v455_v27 = vpop.permute.xlu1 %454  ;;  %v451_v29 = vpop.permute.xlu0 %450  ;;  %3439 = vmatprep.subr.bf16.mxu1 %v3861_v0 }
 0x242   :  { %v3437_v36 = vpack.c.bf16 %v455_v27, %v451_v29  ;;  %v4180_v27 = vld [vmem:[#allocation2 + $0x20] sm:$0xff] }
 0x243   :  { %647 = vbcast.lane.b32.xlu1 %v4101_v53, 360  ;;  %643 = vbcast.lane.b32.xlu0 %v4101_v53, 352 }
 0x244   :  { %3438 = vmatpush3.bf16.msra.mxu0 %v3437_v36  ;;  %3032 = vmatmul.mubr.f32.vlgmr.msra.gmra.mrb[2].mxu1 %v4147_v34 }
 0x245   :  { %v466_v38 = vpop.permute.xlu1 %465  ;;  %v462_v40 = vpop.permute.xlu0 %461  ;;  %3463 = vmatprep.subr.bf16.mxu0 %v3861_v0  ;;  %3101 = vmatprep.mubr.msk.f32.mxu1 %vm3862_vm0, %v3863_v1 }
 0x246   :  { %v3440_v43 = vpack.c.bf16 %v466_v38, %v462_v40  ;;  %v4184_v40 = vld [vmem:[#allocation2 + $0x28] sm:$0xff] }
 0x247   :  { %714 = vbcast.lane.b32.xlu1 %v4111_v56, 360  ;;  %710 = vbcast.lane.b32.xlu0 %v4111_v56, 352 }
 0x248   :  { %3441 = vmatpush3.bf16.msra.mxu1 %v3440_v43  ;;  %3067 = vmatmul.mubr.f32.vlgmr.msra.gmra.mrb[4].mxu0 %v4153_v42 }
 0x249   :  { %v533_v44 = vpop.permute.xlu1 %532  ;;  %v529_v45 = vpop.permute.xlu0 %528  ;;  %3442 = vmatprep.subr.bf16.mxu1 %v3861_v0  ;;  %3136 = vmatprep.mubr.msk.f32.mxu0 %vm3862_vm0, %v3863_v1 }
 0x24a   :  { %v3464_v48 = vpack.c.bf16 %v533_v44, %v529_v45 }
 0x24b   :  { %655 = vbcast.lane.b32.xlu1 %v4101_v53, 376  ;;  %651 = vbcast.lane.b32.xlu0 %v4101_v53, 368 }
 0x24c   :  { %3465 = vmatpush3.bf16.msra.mxu0 %v3464_v48 }
 0x24d   :  { %v474_v50 = vpop.permute.xlu1 %473  ;;  %v470_v54 = vpop.permute.xlu0 %469  ;;  %3466 = vmatprep.subr.bf16.mxu0 %v3861_v0 }
 0x24e   :  { %v3443_v55 = vpack.c.bf16 %v474_v50, %v470_v54 }
 0x24f   :  { %722 = vbcast.lane.b32.xlu1 %v4111_v56, 376  ;;  %718 = vbcast.lane.b32.xlu0 %v4111_v56, 368 }
 0x250   :  { %3444 = vmatpush3.bf16.msra.mxu1 %v3443_v55 }
 0x251   :  { %v541_v57 = vpop.permute.xlu1 %540  ;;  %v537_v58 = vpop.permute.xlu0 %536  ;;  %3445 = vmatprep.subr.bf16.mxu1 %v3861_v0 }
 0x252   :  { %v3467_v59 = vpack.c.bf16 %v541_v57, %v537_v58 }
 0x254   :  { %3468 = vmatpush3.bf16.msra.mxu0 %v3467_v59 }
 0x255   :  { %v482_v28 = vpop.permute.xlu1 %481  ;;  %v478_v60 = vpop.permute.xlu0 %477  ;;  %3469 = vmatprep.subr.bf16.mxu0 %v3861_v0 }
 0x256   :  { %v3446_v53 = vpack.c.bf16 %v482_v28, %v478_v60 }
 0x258   :  { %3447 = vmatpush3.bf16.msra.mxu1 %v3446_v53 }
 0x259   :  { %v549_v61 = vpop.permute.xlu1 %548  ;;  %v545_v62 = vpop.permute.xlu0 %544  ;;  %3448 = vmatprep.subr.bf16.mxu1 %v3861_v0 }
 0x25a   :  { %v3470_v33 = vpack.c.bf16 %v549_v61, %v545_v62 }
 0x25c   :  { %3471 = vmatpush3.bf16.msra.mxu0 %v3470_v33 }
 0x25d   :  { %v490_v56 = vpop.permute.xlu1 %489  ;;  %v486_v63 = vpop.permute.xlu0 %485  ;;  %3472 = vmatprep.subr.bf16.mxu0 %v3861_v0 }
 0x25e   :  { %v3449_v2 = vpack.c.bf16 %v490_v56, %v486_v63 }
 0x260   :  { %3450 = vmatpush3.bf16.msra.mxu1 %v3449_v2 }
 0x261   :  { %v557_v3 = vpop.permute.xlu1 %556  ;;  %v553_v4 = vpop.permute.xlu0 %552  ;;  %3451 = vmatprep.subr.bf16.mxu1 %v3861_v0 }
 0x262   :  { %v3473_v5 = vpack.c.bf16 %v557_v3, %v553_v4 }
 0x264   :  { %3474 = vmatpush3.bf16.msra.mxu0 %v3473_v5 }
 0x265   :  { %v498_v6 = vpop.permute.xlu1 %497  ;;  %v494_v7 = vpop.permute.xlu0 %493  ;;  %3475 = vmatprep.subr.bf16.mxu0 %v3861_v0 }
 0x266   :  { %v3452_v8 = vpack.c.bf16 %v498_v6, %v494_v7 }
 0x268   :  { %3453 = vmatpush3.bf16.msra.mxu1 %v3452_v8 }
 0x269   :  { %v565_v9 = vpop.permute.xlu1 %564  ;;  %v561_v10 = vpop.permute.xlu0 %560  ;;  %3454 = vmatprep.subr.bf16.mxu1 %v3861_v0 }
 0x26a   :  { %v3476_v11 = vpack.c.bf16 %v565_v9, %v561_v10 }
 0x26c   :  { %3477 = vmatpush3.bf16.msra.mxu0 %v3476_v11 }
 0x26d   :  { %v506_v12 = vpop.permute.xlu1 %505  ;;  %v502_v13 = vpop.permute.xlu0 %501  ;;  %3478 = vmatprep.subr.bf16.mxu0 %v3861_v0 }
 0x26e   :  { %v3455_v14 = vpack.c.bf16 %v506_v12, %v502_v13 }
 0x270   :  { %3456 = vmatpush3.bf16.msra.mxu1 %v3455_v14 }
 0x271   :  { %v573_v15 = vpop.permute.xlu1 %572  ;;  %v569_v16 = vpop.permute.xlu0 %568  ;;  %3457 = vmatprep.subr.bf16.mxu1 %v3861_v0 }
 0x272   :  { %v3479_v17 = vpack.c.bf16 %v573_v15, %v569_v16 }
 0x274   :  { %3480 = vmatpush3.bf16.msra.mxu0 %v3479_v17 }
 0x275   :  { %v514_v18 = vpop.permute.xlu1 %513  ;;  %v510_v19 = vpop.permute.xlu0 %509  ;;  %3481 = vmatprep.subr.bf16.mxu0 %v3861_v0 }
 0x276   :  { %v3458_v20 = vpack.c.bf16 %v514_v18, %v510_v19 }
 0x278   :  { %3459 = vmatpush3.bf16.msra.mxu1 %v3458_v20 }
 0x279   :  { %v581_v21 = vpop.permute.xlu1 %580  ;;  %v577_v22 = vpop.permute.xlu0 %576  ;;  %3460 = vmatprep.subr.bf16.mxu1 %v3861_v0 }
 0x27a   :  { %v3482_v23 = vpack.c.bf16 %v581_v21, %v577_v22 }
 0x27c   :  { %3483 = vmatpush3.bf16.msra.mxu0 %v3482_v23 }
 0x27d   :  { %v522_v24 = vpop.permute.xlu1 %521  ;;  %v518_v25 = vpop.permute.xlu0 %517  ;;  %3484 = vmatprep.subr.bf16.mxu0 %v3861_v0 }
 0x27e   :  { %v3461_v26 = vpack.c.bf16 %v522_v24, %v518_v25 }
 0x280   :  { %3462 = vmatpush3.bf16.msra.mxu1 %v3461_v26 }
 0x281   :  { %v589_v29 = vpop.permute.xlu1 %588  ;;  %v585_v36 = vpop.permute.xlu0 %584  ;;  %3487 = vmatprep.subr.bf16.mxu1 %v3861_v0 }
 0x282   :  { %v3485_v38 = vpack.c.bf16 %v589_v29, %v585_v36  ;;  %v4206_v36 = vld [vmem:[#allocation2 + $0x30] sm:$0xff] }
 0x283   :  { %3102 = vmatmul.mubr.f32.vlgmr.msra.gmra.mrb[4].mxu1 %v4180_v27 }
 0x284   :  { %3486 = vmatpush3.bf16.msra.mxu0 %v3485_v38  ;;  %3171 = vmatprep.mubr.msk.f32.mxu1 %vm3862_vm0, %v3863_v1 }
 0x285   :  { %v600_v43 = vpop.permute.xlu1 %599  ;;  %v596_v44 = vpop.permute.xlu0 %595  ;;  %3511 = vmatprep.subr.bf16.mxu0 %v3861_v0 }
 0x286   :  { %v3488_v45 = vpack.c.bf16 %v600_v43, %v596_v44 }
 0x287   :  { %3137 = vmatmul.mubr.f32.vlgmr.msra.gmra.mrb[6].mxu0 %v4184_v40 }
 0x288   :  { %3489 = vmatpush3.bf16.msra.mxu1 %v3488_v45  ;;  %3206 = vmatprep.mubr.msk.f32.mxu0 %vm3862_vm0, %v3863_v1  ;;  %v4210_v45 = vld [vmem:[#allocation2 + $0x38] sm:$0xff] }
 0x289   :  { %v667_v48 = vpop.permute.xlu1 %666  ;;  %v663_v49 = vpop.permute.xlu0 %662  ;;  %3490 = vmatprep.subr.bf16.mxu1 %v3861_v0 }
 0x28a   :  { %v3512_v50 = vpack.c.bf16 %v667_v48, %v663_v49 }
 0x28c   :  { %3513 = vmatpush3.bf16.msra.mxu0 %v3512_v50 }
 0x28d   :  { %v608_v54 = vpop.permute.xlu1 %607  ;;  %v604_v55 = vpop.permute.xlu0 %603  ;;  %3514 = vmatprep.subr.bf16.mxu0 %v3861_v0 }
 0x28e   :  { %v3491_v57 = vpack.c.bf16 %v608_v54, %v604_v55 }
 0x290   :  { %3492 = vmatpush3.bf16.msra.mxu1 %v3491_v57 }
 0x291   :  { %v675_v58 = vpop.permute.xlu1 %674  ;;  %v671_v59 = vpop.permute.xlu0 %670  ;;  %3493 = vmatprep.subr.bf16.mxu1 %v3861_v0 }
 0x292   :  { %v3515_v28 = vpack.c.bf16 %v675_v58, %v671_v59 }
 0x294   :  { %3516 = vmatpush3.bf16.msra.mxu0 %v3515_v28 }
 0x295   :  { %v616_v60 = vpop.permute.xlu1 %615  ;;  %v612_v53 = vpop.permute.xlu0 %611  ;;  %3517 = vmatprep.subr.bf16.mxu0 %v3861_v0 }
 0x296   :  { %v3494_v61 = vpack.c.bf16 %v616_v60, %v612_v53 }
 0x298   :  { %3495 = vmatpush3.bf16.msra.mxu1 %v3494_v61 }
 0x299   :  { %v683_v62 = vpop.permute.xlu1 %682  ;;  %v679_v33 = vpop.permute.xlu0 %678  ;;  %3496 = vmatprep.subr.bf16.mxu1 %v3861_v0 }
 0x29a   :  { %v3518_v56 = vpack.c.bf16 %v683_v62, %v679_v33 }
 0x29c   :  { %3519 = vmatpush3.bf16.msra.mxu0 %v3518_v56 }
 0x29d   :  { %v624_v63 = vpop.permute.xlu1 %623  ;;  %v620_v2 = vpop.permute.xlu0 %619  ;;  %3520 = vmatprep.subr.bf16.mxu0 %v3861_v0 }
 0x29e   :  { %v3497_v3 = vpack.c.bf16 %v624_v63, %v620_v2 }
 0x2a0   :  { %3498 = vmatpush3.bf16.msra.mxu1 %v3497_v3 }
 0x2a1   :  { %v691_v4 = vpop.permute.xlu1 %690  ;;  %v687_v5 = vpop.permute.xlu0 %686  ;;  %3499 = vmatprep.subr.bf16.mxu1 %v3861_v0 }
 0x2a2   :  { %v3521_v6 = vpack.c.bf16 %v691_v4, %v687_v5 }
 0x2a4   :  { %3522 = vmatpush3.bf16.msra.mxu0 %v3521_v6 }
 0x2a5   :  { %v632_v7 = vpop.permute.xlu1 %631  ;;  %v628_v8 = vpop.permute.xlu0 %627  ;;  %3523 = vmatprep.subr.bf16.mxu0 %v3861_v0 }
 0x2a6   :  { %v3500_v9 = vpack.c.bf16 %v632_v7, %v628_v8 }
 0x2a8   :  { %3501 = vmatpush3.bf16.msra.mxu1 %v3500_v9 }
 0x2a9   :  { %v699_v10 = vpop.permute.xlu1 %698  ;;  %v695_v11 = vpop.permute.xlu0 %694  ;;  %3502 = vmatprep.subr.bf16.mxu1 %v3861_v0 }
 0x2aa   :  { %v3524_v12 = vpack.c.bf16 %v699_v10, %v695_v11 }
 0x2ac   :  { %3525 = vmatpush3.bf16.msra.mxu0 %v3524_v12 }
 0x2ad   :  { %v640_v13 = vpop.permute.xlu1 %639  ;;  %v636_v14 = vpop.permute.xlu0 %635  ;;  %3526 = vmatprep.subr.bf16.mxu0 %v3861_v0 }
 0x2ae   :  { %v3503_v15 = vpack.c.bf16 %v640_v13, %v636_v14 }
 0x2b0   :  { %3504 = vmatpush3.bf16.msra.mxu1 %v3503_v15 }
 0x2b1   :  { %v707_v16 = vpop.permute.xlu1 %706  ;;  %v703_v17 = vpop.permute.xlu0 %702  ;;  %3505 = vmatprep.subr.bf16.mxu1 %v3861_v0 }
 0x2b2   :  { %v3527_v18 = vpack.c.bf16 %v707_v16, %v703_v17 }
 0x2b4   :  { %3528 = vmatpush3.bf16.msra.mxu0 %v3527_v18 }
 0x2b5   :  { %v648_v19 = vpop.permute.xlu1 %647  ;;  %v644_v20 = vpop.permute.xlu0 %643  ;;  %3529 = vmatprep.subr.bf16.mxu0 %v3861_v0 }
 0x2b6   :  { %v3506_v21 = vpack.c.bf16 %v648_v19, %v644_v20 }
 0x2b8   :  { %3507 = vmatpush3.bf16.msra.mxu1 %v3506_v21 }
 0x2b9   :  { %v715_v22 = vpop.permute.xlu1 %714  ;;  %v711_v23 = vpop.permute.xlu0 %710  ;;  %3508 = vmatprep.subr.bf16.mxu1 %v3861_v0 }
 0x2ba   :  { %v3530_v24 = vpack.c.bf16 %v715_v22, %v711_v23 }
 0x2bc   :  { %3531 = vmatpush3.bf16.msra.mxu0 %v3530_v24 }
 0x2bd   :  { %v656_v25 = vpop.permute.xlu1 %655  ;;  %v652_v26 = vpop.permute.xlu0 %651  ;;  %3532 = vmatprep.subr.bf16.mxu0 %v3861_v0 }
 0x2be   :  { %v3509_v29 = vpack.c.bf16 %v656_v25, %v652_v26 }
 0x2c0   :  { %3510 = vmatpush3.bf16.msra.mxu1 %v3509_v29 }
 0x2c1   :  { %v723_v38 = vpop.permute.xlu1 %722  ;;  %v719_v43 = vpop.permute.xlu0 %718  ;;  %3209 = vmatprep.subr.mxu1 %v3863_v1 }
 0x2c2   :  { %v3533_v44 = vpack.c.bf16 %v723_v38, %v719_v43 }
 0x2c3   :  { %3172 = vmatmul.mubr.f32.vlgmr.msra.gmra.mrb[6].mxu1 %v4206_v36 }
 0x2c4   :  { %3534 = vmatpush3.bf16.msra.mxu0 %v3533_v44  ;;  %3210 = vmatpush3.msra.mxu1 %v4075_v35 }
 0x2c5   :  { %3211 = vmatprep.mubr.msk.f32.mxu1 %vm3862_vm0, %v3863_v1  ;;  %3214 = vmatprep.subr.mxu1 %v3863_v1 }
 0x2c7   :  { %3207 = vmatmul.mubr.f32.vlgmr.msra.gmra.mrb[8].mxu0 %v4210_v45 }
 0x2c8   :  { %2358 = vmatprep.mubr.f32.mxu0 %v3863_v1 }
 0x2d7   :  { %v790_v48 = vpop.f32.mrb[0].mxu1 }
 0x2d8   :  { %1293 = vperm.xlu0 %3667, %v790_v48   ;;  %v2963_v49 = vpop.f32.mrb[1].mxu1 }
 0x2db   :  { %v860_v50 = vpop.f32.mrb[2].mxu0 }
 0x2dc   :  { %1296 = vperm.xlu1 %3668, %v860_v50   ;;  %v2998_v54 = vpop.f32.mrb[3].mxu0 }
 0x317   :  { %v930_v55 = vpop.f32.mrb[2].mxu1 }
 0x318   :  { %1299 = vperm.xlu1 %3668, %v930_v55   ;;  %v3033_v57 = vpop.f32.mrb[3].mxu1 }
 0x31b   :  { %v1000_v58 = vpop.f32.mrb[4].mxu0 }
 0x31c   :  { %1302 = vperm.xlu0 %3667, %v1000_v58   ;;  %v3068_v35 = vpop.f32.mrb[5].mxu0 }
 0x356   :  { %v1070_v59 = vpop.f32.mrb[4].mxu1 }
 0x357   :  { %1305 = vperm.xlu1 %3668, %v1070_v59   ;;  %v3103_v28 = vpop.f32.mrb[5].mxu1  ;;  %v1294_v2 = vpop.permute.xlu0 %1293 }
 0x358   :  { %v1321_v5 = vrot.slane %v1294_v2, %v3998_v30 }
 0x35a   :  { %v4218_v60 = vpop.f32.mrb[6].mxu0 }
 0x35b   :  { %1308 = vperm.xlu0 %3667, %v4218_v60   ;;  %v3138_v53 = vpop.f32.mrb[7].mxu0  ;;  %v1297_v63 = vpop.permute.xlu1 %1296 }
 0x35c   :  { %v1325_v4 = vrot.slane %v1297_v63, %v3998_v30 }
 0x35e   :  { %v1351_v9 = vsel %vm1350_vm1, %v1325_v4, %v1321_v5 }
 0x396   :  { %v4221_v61 = vpop.f32.mrb[6].mxu1 }
 0x397   :  { %1311 = vperm.xlu1 %3668, %v4221_v61   ;;  %v3173_v62 = vpop.f32.mrb[7].mxu1  ;;  %v1300_v3 = vpop.permute.xlu1 %1299 }
 0x398   :  { %v1329_v7 = vrot.slane %v1300_v3, %v3998_v30 }
 0x39a   :  { %v4224_v33 = vpop.f32.mrb[8].mxu0  ;;  %v1353_v12 = vsel %vm1352_vm2, %v1329_v7, %v1351_v9 }
 0x39b   :  { %v3208_v56 = vpop.f32.mrb[9].mxu0  ;;  %1314 = vperm.xlu0 %3667, %v4224_v33   ;;  %v1303_v6 = vpop.permute.xlu0 %1302 }
 0x39c   :  { %v1333_v11 = vrot.slane %v1303_v6, %v3998_v30 }
 0x39e   :  { %v1355_v17 = vsel %vm1354_vm3, %v1333_v11, %v1353_v12 }
 0x3d6   :  { %v1306_v8 = vpop.permute.xlu1 %1305 }
 0x3d7   :  { %v1337_v13 = vrot.slane %v1306_v8, %v3998_v30 }
 0x3d9   :  { %v1357_v18 = vsel %vm1356_vm4, %v1337_v13, %v1355_v17 }
 0x3da   :  { %v1309_v10 = vpop.permute.xlu0 %1308 }
 0x3db   :  { %v1341_v15 = vrot.slane %v1309_v10, %v3998_v30 }
 0x3dd   :  { %v1359_v20 = vsel %vm1358_vm5, %v1341_v15, %v1357_v18 }
 0x416   :  { %v1312_v14 = vpop.permute.xlu1 %1311 }
 0x417   :  { %v1345_v16 = vrot.slane %v1312_v14, %v3998_v30 }
 0x419   :  { %v1361_v22 = vsel %vm1360_vm6, %v1345_v16, %v1359_v20 }
 0x41a   :  { %v1315_v19 = vpop.permute.xlu0 %1314 }
 0x41b   :  { %v1349_v21 = vrot.slane %v1315_v19, %v3998_v30 }
 0x41d   :  { %v1363_v23 = vsel %vm1362_vm7, %v1349_v21, %v1361_v22 }
 0x41e   :  { %v1366_v24 = vsel %vm1365_vm8, %v1363_v23, -inf }
 0x41f   :  { %1367 = vmax.xlane.f32.xlu1 %v1366_v24 }
 0x4ac   :  { %v1368_v25 = vpop.xlane.xlu1 %1367 }
 0x4ad   :  { %v1373_v26 = vrot.slane %v1368_v25, %v4001_v31  ;;  %v1377_v29 = vrot.slane %v1368_v25, %v4004_v32  ;;  %v1381_v38 = vrot.slane %v1368_v25, %v4013_v37  ;;  %v1385_v54 = vrot.slane %v1368_v25, %v4018_v39 }
 0x4ae   :  { %v1389_v28 = vrot.slane %v1368_v25, %v4023_v47  ;;  %v1393_v56 = vrot.slane %v1368_v25, %v4032_v52 }
 0x4af   :  { %v1410_v43 = vsub.f32 %v790_v48, %v1373_v26  ;;  %v1411_v44 = vsub.f32 %v860_v50, %v1377_v29  ;;  %v1412_v57 = vsub.f32 %v930_v55, %v1381_v38  ;;  %v1413_v53 = vsub.f32 %v1000_v58, %v1385_v54 }
 0x4b0   :  { %v1414_v63 = vsub.f32 %v1070_v59, %v1389_v28  ;;  %v1397_v48 = vrot.slane %v1368_v25, %v4094_v46  ;;  %v1415_v50 = vsub.f32 %v4218_v60, %v1393_v56  ;;  %v1401_v58 = vrot.slane %v1368_v25, %v4104_v51 }
 0x4b1   :  { %v1418_v49 = vmul.f32 1.442695, %v1410_v43  ;;  %v1420_v35 = vmul.f32 1.442695, %v1411_v44  ;;  %v1422_v62 = vmul.f32 1.442695, %v1412_v57 }
 0x4b2   :  { %v1424_v2 = vmul.f32 1.442695, %v1413_v53  ;;  %v1426_v55 = vmul.f32 1.442695, %v1414_v63  ;;  %v1416_v59 = vsub.f32 %v4221_v61, %v1397_v48  ;;  %v1428_v5 = vmul.f32 1.442695, %v1415_v50 }
 0x4b3   :  { %3669 = vpow2.f32 %v1418_v49  ;;  %v1417_v7 = vsub.f32 %v4224_v33, %v1401_v58 }
 0x4b4   :  { %3671 = vpow2.f32 %v1420_v35  ;;  %v1430_v60 = vmul.f32 1.442695, %v1416_v59 }
 0x4b5   :  { %3673 = vpow2.f32 %v1422_v62  ;;  %v1432_v9 = vmul.f32 1.442695, %v1417_v7 }
 0x4b6   :  { %3675 = vpow2.f32 %v1424_v2 }
 0x4b7   :  { %3677 = vpow2.f32 %v1426_v55 }
 0x4b8   :  { %3679 = vpow2.f32 %v1428_v5 }
 0x4b9   :  { %3681 = vpow2.f32 %v1430_v60 }
 0x4ba   :  { %3683 = vpow2.f32 %v1432_v9 }
 0x4bd   :  { %v4249_v3 = vpop.eup %3669 }
 0x4be   :  { %1443 = vperm.xlu0 %3667, %v4249_v3   ;;  %v4254_v4 = vpop.eup %3671 }
 0x4bf   :  { %v4259_v6 = vpop.eup %3673 }
 0x4c0   :  { %v4263_v8 = vpop.eup %3675 }
 0x4c1   :  { %v4266_v10 = vpop.eup %3677 }
 0x4c2   :  { %1446 = vperm.xlu0 %3667, %v4254_v4   ;;  %v3680_v61 = vpop.eup %3679 }
 0x4c3   :  { %v4269_v11 = vpop.eup %3681 }
 0x4c4   :  { %v4272_v33 = vpop.eup %3683 }
 0x4c6   :  { %1449 = vperm.xlu0 %3667, %v4259_v6  }
 0x4ca   :  { %1452 = vperm.xlu0 %3667, %v4263_v8  }
 0x4ce   :  { %1455 = vperm.xlu0 %3667, %v4266_v10  }
 0x4d2   :  { %1458 = vperm.xlu0 %3667, %v3680_v61  }
 0x4d6   :  { %1461 = vperm.xlu0 %3667, %v4269_v11  }
 0x4da   :  { %1464 = vperm.xlu0 %3667, %v4272_v33  }
 0x53d   :  { %v1444_v12 = vpop.permute.xlu0 %1443 }
 0x53e   :  { %v1469_v20 = vrot.slane %v1444_v12, %v3998_v30 }
 0x541   :  { %v1447_v13 = vpop.permute.xlu0 %1446 }
 0x542   :  { %v1473_v18 = vrot.slane %v1447_v13, %v3998_v30 }
 0x544   :  { %v1498_v24 = vsel %vm1350_vm1, %v1473_v18, %v1469_v20 }
 0x545   :  { %v1450_v14 = vpop.permute.xlu0 %1449 }
 0x546   :  { %v1477_v19 = vrot.slane %v1450_v14, %v3998_v30 }
 0x548   :  { %v1499_v26 = vsel %vm1352_vm2, %v1477_v19, %v1498_v24  ;;  %v2209_v24 = vld [vmem:[#allocation8 + $0x18] sm:$0xff] }
 0x549   :  { %v1453_v15 = vpop.permute.xlu0 %1452 }
 0x54a   :  { %v1481_v21 = vrot.slane %v1453_v15, %v3998_v30 }
 0x54c   :  { %v1500_v38 = vsel %vm1354_vm3, %v1481_v21, %v1499_v26  ;;  %v2208_v26 = vld [vmem:[#allocation8 + $0x10] sm:$0xff] }
 0x54d   :  { %v1456_v16 = vpop.permute.xlu0 %1455 }
 0x54e   :  { %v1485_v22 = vrot.slane %v1456_v16, %v3998_v30 }
 0x550   :  { %v1501_v43 = vsel %vm1356_vm4, %v1485_v22, %v1500_v38  ;;  %v2213_v38 = vld [vmem:[#allocation8 + $0x38] sm:$0xff] }
 0x551   :  { %v1459_v17 = vpop.permute.xlu0 %1458 }
 0x552   :  { %v1489_v25 = vrot.slane %v1459_v17, %v3998_v30 }
 0x554   :  { %v1502_v49 = vsel %vm1358_vm5, %v1489_v25, %v1501_v43 }
 0x555   :  { %v1462_v23 = vpop.permute.xlu0 %1461 }
 0x556   :  { %v1493_v29 = vrot.slane %v1462_v23, %v3998_v30 }
 0x558   :  { %v1503_v57 = vsel %vm1360_vm6, %v1493_v29, %v1502_v49  ;;  %v2211_v29 = vld [vmem:[#allocation8 + $0x28] sm:$0xff] }
 0x559   :  { %v1465_v44 = vpop.permute.xlu0 %1464  ;;  %v3568_v43 = vpack.c.bf16 %v2211_v29, %v2208_v26  ;;  %v2215_v49 = vld [vmem:[#allocation8 + $0x48] sm:$0xff]  ;;  %v2248_v29 = vld [vmem:[#allocation8 + $0x150] sm:$0xff] }
 0x55a   :  { %v1497_v54 = vrot.slane %v1465_v44, %v3998_v30 }
 0x55c   :  { %v1504_v35 = vsel %vm1362_vm7, %v1497_v54, %v1503_v57  ;;  %v2214_v54 = vld [vmem:[#allocation8 + $0x40] sm:$0xff] }
 0x55d   :  { %v1506_v28 = vsel %vm1365_vm8, %v1504_v35, 0.0  ;;  %v2217_v35 = vld [vmem:[#allocation8 + $0x58] sm:$0xff] }
 0x55e   :  { %1507 = vadd.xlane.f32.xlu0 %v1506_v28  ;;  %v2219_v28 = vld [vmem:[#allocation8 + $0x68] sm:$0xff] }
 0x5eb   :  { %v1508_v53 = vpop.xlane.xlu0 %1507 }
 0x5ec   :  { %v1533_v62 = vrot.slane %v1508_v53, %v4032_v52  ;;  %v1513_v56 = vrot.slane %v1508_v53, %v4001_v31  ;;  %v1517_v63 = vrot.slane %v1508_v53, %v4004_v32  ;;  %v1521_v2 = vrot.slane %v1508_v53, %v4013_v37 }
 0x5ed   :  { %v1525_v48 = vrot.slane %v1508_v53, %v4018_v39  ;;  %v1529_v59 = vrot.slane %v1508_v53, %v4023_v47  ;;  %v1537_v7 = vrot.slane %v1508_v53, %v4094_v46  ;;  %v1541_v39 = vrot.slane %v1508_v53, %v4104_v51  ;;  %v2207_v51 = vld [vmem:[#allocation8 + $0x8] sm:$0xff]  ;;  %v2222_v53 = vld [vmem:[#allocation8 + $0x80] sm:$0xff] }
 0x5ee   :  { %3685 = vrcp.f32 %v1533_v62  ;;  %v3571_v62 = vpack.c.bf16 %v2217_v35, %v2214_v54 }
 0x5ef   :  { %3687 = vrcp.f32 %v1513_v56  ;;  %v3543_v56 = vpack.c.bf16 %v2222_v53, %v2219_v28 }
 0x5f0   :  { %3689 = vrcp.f32 %v1517_v63  ;;  %v2218_v63 = vld [vmem:[#allocation8 + $0x60] sm:$0xff] }
 0x5f1   :  { %3691 = vrcp.f32 %v1521_v2  ;;  %v2221_v2 = vld [vmem:[#allocation8 + $0x78] sm:$0xff] }
 0x5f2   :  { %3693 = vrcp.f32 %v1525_v48  ;;  %v2220_v48 = vld [vmem:[#allocation8 + $0x70] sm:$0xff] }
 0x5f3   :  { %3695 = vrcp.f32 %v1529_v59  ;;  %v2228_v59 = vld [vmem:[#allocation8 + $0xb0] sm:$0xff] }
 0x5f4   :  { %3697 = vrcp.f32 %v1537_v7  ;;  %v2224_v7 = vld [vmem:[#allocation8 + $0x90] sm:$0xff] }
 0x5f5   :  { %3699 = vrcp.f32 %v1541_v39 }
 0x5f8   :  { %v3686_v50 = vpop.eup %3685 }
 0x5f9   :  { %v3688_v55 = vpop.eup %3687  ;;  %v1561_v58 = vmul.f32 %v3686_v50, %v3680_v61  ;;  %v3545_v50 = vpack.c.bf16 %v2221_v2, %v2218_v63 }
 0x5fa   :  { %v1551_v52 = vmul.f32 %v3688_v55, %v4249_v3  ;;  %v3690_v5 = vpop.eup %3689  ;;  %v2223_v55 = vld [vmem:[#allocation8 + $0x88] sm:$0xff] }
 0x5fb   :  { %1968 = vperm.xlu0 %3667, %v1561_v58   ;;  %v1553_v60 = vmul.f32 %v3690_v5, %v4254_v4  ;;  %v3692_v9 = vpop.eup %3691  ;;  %v2225_v58 = vld [vmem:[#allocation8 + $0x98] sm:$0xff] }
 0x5fc   :  { %1568 = vperm.xlu1 %3668, %v1551_v52   ;;  %v1555_v61 = vmul.f32 %v3692_v9, %v4259_v6  ;;  %v3694_v12 = vpop.eup %3693  ;;  %v2210_v6 = vld [vmem:[#allocation8 + $0x20] sm:$0xff]  ;;  %v3574_v52 = vpack.c.bf16 %v2223_v55, %v2220_v48  ;;  %v3547_v5 = vpack.c.bf16 %v2228_v59, %v2225_v58 }
 0x5fd   :  { %v1557_v47 = vmul.f32 %v3694_v12, %v4263_v8  ;;  %v3696_v3 = vpop.eup %3695  ;;  %v3535_v16 = vpack.c.bf16 %v2210_v6, %v2207_v51  ;;  %v2226_v9 = vld [vmem:[#allocation8 + $0xa0] sm:$0xff]  ;;  %v2231_v12 = vld [vmem:[#allocation8 + $0xc8] sm:$0xff]  ;;  %v2237_v6 = vld [vmem:[#allocation8 + $0xf8] sm:$0xff] }
 0x5fe   :  { %v1559_v13 = vmul.f32 %v3696_v3, %v4266_v10  ;;  %v3698_v14 = vpop.eup %3697  ;;  %v2235_v51 = vld [vmem:[#allocation8 + $0xe8] sm:$0xff] }
 0x5ff   :  { %v1563_v46 = vmul.f32 %v3698_v14, %v4269_v11  ;;  %v3700_v4 = vpop.eup %3699  ;;  %3536 = vmatprep.subr.bf16.mxu0 %v3535_v16  ;;  %v2230_v14 = vld [vmem:[#allocation8 + $0xc0] sm:$0xff]  ;;  %v2240_v16 = vld [vmem:[#allocation8 + $0x110] sm:$0xff] }
 0x600   :  { %1648 = vperm.xlu1 %3668, %v1553_v60   ;;  %v1565_v15 = vmul.f32 %v3700_v4, %v4272_v33  ;;  %v2227_v60 = vld [vmem:[#allocation8 + $0xa8] sm:$0xff]  ;;  %v2232_v4 = vld [vmem:[#allocation8 + $0xd0] sm:$0xff] }
 0x601   :  { %v3549_v39 = vpack.c.bf16 %v2227_v60, %v2224_v7 }
 0x604   :  { %1728 = vperm.xlu1 %3668, %v1555_v61   ;;  %v2229_v61 = vld [vmem:[#allocation8 + $0xb8] sm:$0xff] }
 0x605   :  { %v3577_v3 = vpack.c.bf16 %v2229_v61, %v2226_v9 }
 0x608   :  { %1808 = vperm.xlu1 %3668, %v1557_v47   ;;  %v2234_v47 = vld [vmem:[#allocation8 + $0xe0] sm:$0xff] }
 0x60c   :  { %1888 = vperm.xlu1 %3668, %v1559_v13   ;;  %v3551_v13 = vpack.c.bf16 %v2234_v47, %v2231_v12 }
 0x610   :  { %2048 = vperm.xlu1 %3668, %v1563_v46   ;;  %v2233_v46 = vld [vmem:[#allocation8 + $0xd8] sm:$0xff] }
 0x614   :  { %2128 = vperm.xlu1 %3668, %v1565_v15   ;;  %v3553_v15 = vpack.c.bf16 %v2233_v46, %v2230_v14 }
 0x67b   :  { %v1569_v17 = vpop.permute.xlu1 %1568 }
 0x67c   :  { %v1573_v8 = vrot.slane %v1569_v17, %v3998_v30  ;;  %v3580_v17 = vpack.c.bf16 %v2235_v51, %v2232_v4  ;;  %v2435_v4 = vld [vmem:[#allocation10] sm:$0xff]  ;;  %v2437_v51 = vld [vmem:[#allocation10 + $0x10] sm:$0xff] }
 0x67e   :  { %3212 = vmatmul.mubr.msk.f32.vlgmr.msra.gmra.mrb[8].mxu1 %vm1365_vm8, %v1573_v8  ;;  %v3555_v8 = vpack.c.bf16 %v2240_v16, %v2237_v6  ;;  %v2440_v6 = vld [vmem:[#allocation10 + $0x28] sm:$0xff] }
 0x67f   :  { %3215 = vmatpush3.msra.mxu1 %v4081_v41  ;;  %v1649_v10 = vpop.permute.xlu1 %1648  ;;  %3216 = vmatprep.mubr.msk.f32.mxu1 %vm3862_vm0, %v3863_v1 }
 0x680   :  { %v1653_v11 = vrot.slane %v1649_v10, %v3998_v30  ;;  %3219 = vmatprep.subr.mxu1 %v3863_v1  ;;  %v2236_v10 = vld [vmem:[#allocation8 + $0xf0] sm:$0xff] }
 0x682   :  { %3217 = vmatmul.mubr.msk.f32.vlgmr.msra.gmra.mrb[10].mxu1 %vm1365_vm8, %v1653_v11  ;;  %v2239_v11 = vld [vmem:[#allocation8 + $0x108] sm:$0xff] }
 0x683   :  { %3220 = vmatpush3.msra.mxu1 %v4147_v34  ;;  %v1729_v33 = vpop.permute.xlu1 %1728  ;;  %3221 = vmatprep.mubr.msk.f32.mxu1 %vm3862_vm0, %v3863_v1 }
 0x684   :  { %v1733_v18 = vrot.slane %v1729_v33, %v3998_v30  ;;  %3224 = vmatprep.subr.mxu1 %v3863_v1  ;;  %v2238_v33 = vld [vmem:[#allocation8 + $0x100] sm:$0xff] }
 0x686   :  { %3222 = vmatmul.mubr.msk.f32.vlgmr.msra.gmra.mrb[12].mxu1 %vm1365_vm8, %v1733_v18  ;;  %v3557_v18 = vpack.c.bf16 %v2239_v11, %v2236_v10 }
 0x687   :  { %3225 = vmatpush3.msra.mxu1 %v4153_v42  ;;  %v1809_v41 = vpop.permute.xlu1 %1808  ;;  %3226 = vmatprep.mubr.msk.f32.mxu1 %vm3862_vm0, %v3863_v1  ;;  %v1969_v42 = vpop.permute.xlu0 %1968 }
 0x688   :  { %v1813_v19 = vrot.slane %v1809_v41, %v3998_v30  ;;  %3229 = vmatprep.subr.mxu1 %v3863_v1  ;;  %v1973_v22 = vrot.slane %v1969_v42, %v3998_v30  ;;  %v2241_v41 = vld [vmem:[#allocation8 + $0x118] sm:$0xff] }
 0x68a   :  { %3227 = vmatmul.mubr.msk.f32.vlgmr.msra.gmra.mrb[14].mxu1 %vm1365_vm8, %v1813_v19  ;;  %v2243_v19 = vld [vmem:[#allocation8 + $0x128] sm:$0xff] }
 0x68b   :  { %3230 = vmatpush3.msra.mxu1 %v4180_v27  ;;  %v1889_v34 = vpop.permute.xlu1 %1888  ;;  %3231 = vmatprep.mubr.msk.f32.mxu1 %vm3862_vm0, %v3863_v1 }
 0x68c   :  { %v1893_v20 = vrot.slane %v1889_v34, %v3998_v30  ;;  %3234 = vmatprep.subr.mxu1 %v3863_v1  ;;  %v2246_v34 = vld [vmem:[#allocation8 + $0x140] sm:$0xff] }
 0x68d   :  { %v3559_v42 = vpack.c.bf16 %v2246_v34, %v2243_v19  ;;  %v3624_v19 = vpack.c.bf16 %v2440_v6, %v2437_v51  ;;  %v2476_v51 = vld [vmem:[#allocation10 + $0x148] sm:$0xff]  ;;  %v2478_v6 = vld [vmem:[#allocation10 + $0x158] sm:$0xff] }
 0x68e   :  { %3232 = vmatmul.mubr.msk.f32.vlgmr.msra.gmra.mrb[16].mxu1 %vm1365_vm8, %v1893_v20  ;;  %v3583_v20 = vpack.c.bf16 %v2241_v41, %v2238_v33  ;;  %v2441_v41 = vld [vmem:[#allocation10 + $0x30] sm:$0xff] }
 0x68f   :  { %3235 = vmatpush3.msra.mxu1 %v4184_v40  ;;  %v2049_v21 = vpop.permute.xlu1 %2048  ;;  %3236 = vmatprep.mubr.msk.f32.mxu1 %vm3862_vm0, %v3863_v1 }
 0x690   :  { %3239 = vmatprep.subr.mxu1 %v3863_v1  ;;  %v2053_v27 = vrot.slane %v2049_v21, %v3998_v30  ;;  %v2242_v21 = vld [vmem:[#allocation8 + $0x120] sm:$0xff] }
 0x692   :  { %3237 = vmatmul.mubr.msk.f32.vlgmr.msra.gmra.mrb[18].mxu1 %vm1365_vm8, %v1973_v22  ;;  %v2245_v22 = vld [vmem:[#allocation8 + $0x138] sm:$0xff] }
 0x693   :  { %3240 = vmatpush3.msra.mxu1 %v4206_v36  ;;  %3241 = vmatprep.mubr.msk.f32.mxu1 %vm3862_vm0, %v3863_v1  ;;  %v2129_v40 = vpop.permute.xlu1 %2128  ;;  %v2206_v36 = vld [vmem:[#allocation8] sm:$0xff] }
 0x694   :  { %3244 = vmatprep.subr.mxu1 %v3863_v1  ;;  %v2133_v23 = vrot.slane %v2129_v40, %v3998_v30  ;;  %v3537_v25 = vpack.c.bf16 %v2209_v24, %v2206_v36  ;;  %v2212_v30 = vld [vmem:[#allocation8 + $0x30] sm:$0xff]  ;;  %v3561_v40 = vpack.c.bf16 %v2245_v22, %v2242_v21  ;;  %v2249_v36 = vld [vmem:[#allocation8 + $0x158] sm:$0xff] }
 0x695   :  { %v3541_v57 = vpack.c.bf16 %v2215_v49, %v2212_v30  ;;  %v2252_v24 = vld [vmem:[#allocation8 + $0x170] sm:$0xff]  ;;  %v2436_v30 = vld [vmem:[#allocation10 + $0x8] sm:$0xff]  ;;  %v2439_v49 = vld [vmem:[#allocation10 + $0x20] sm:$0xff] }
 0x696   :  { %3242 = vmatmul.mubr.msk.f32.vlgmr.msra.gmra.mrb[20].mxu1 %vm1365_vm8, %v2053_v27  ;;  %3538 = vmatpush1.bf16.msra.mxu0 %v3537_v25  ;;  %v2244_v27 = vld [vmem:[#allocation8 + $0x130] sm:$0xff]  ;;  %v3563_v26 = vpack.c.bf16 %v2252_v24, %v2249_v36  ;;  %v2446_v21 = vld [vmem:[#allocation10 + $0x58] sm:$0xff]  ;;  %v2447_v36 = vld [vmem:[#allocation10 + $0x60] sm:$0xff] }
 0x697   :  { %3245 = vmatpush3.msra.mxu1 %v4210_v45  ;;  %3246 = vmatprep.mubr.msk.f32.mxu1 %vm3862_vm0, %v3863_v1  ;;  %v2216_v45 = vld [vmem:[#allocation8 + $0x50] sm:$0xff] }
 0x698   :  { %3567 = vmatprep.subr.bf16.mxu1 %v3861_v0  ;;  %v3539_v44 = vpack.c.bf16 %v2216_v45, %v2213_v38  ;;  %v2251_v38 = vld [vmem:[#allocation8 + $0x168] sm:$0xff] }
 0x699   :  { %v3565_v45 = vpack.c.bf16 %v2251_v38, %v2248_v29  ;;  %v2449_v29 = vld [vmem:[#allocation10 + $0x70] sm:$0xff]  ;;  %v2452_v38 = vld [vmem:[#allocation10 + $0x88] sm:$0xff] }
 0x69a   :  { %3247 = vmatmul.mubr.msk.f32.vlgmr.msra.gmra.mrb[22].mxu1 %vm1365_vm8, %v2133_v23  ;;  %3540 = vmatprep.subr.bf16.mxu0 %v3539_v44  ;;  %v2247_v23 = vld [vmem:[#allocation8 + $0x148] sm:$0xff]  ;;  %v2253_v44 = vld [vmem:[#allocation8 + $0x178] sm:$0xff] }
 0x69b   :  { %3281 = vmatprep.mubr.msk.f32.mxu1 %vm3862_vm0, %v3863_v1  ;;  %3569 = vmatpush3.bf16.msra.mxu1 %v3568_v43  ;;  %v3586_v25 = vpack.c.bf16 %v2247_v23, %v2244_v27  ;;  %v2250_v43 = vld [vmem:[#allocation8 + $0x160] sm:$0xff]  ;;  %v2448_v27 = vld [vmem:[#allocation10 + $0x68] sm:$0xff] }
 0x69c   :  { %3570 = vmatprep.subr.bf16.mxu1 %v3861_v0  ;;  %3542 = vmatpush1.bf16.msra.mxu0 %v3541_v57  ;;  %v3589_v54 = vpack.c.bf16 %v2253_v44, %v2250_v43  ;;  %v3591_v57 = vpack.c.bf16 %v2439_v49, %v2436_v30  ;;  %v2454_v43 = vld [vmem:[#allocation10 + $0x98] sm:$0xff]  ;;  %v2453_v30 = vld [vmem:[#allocation10 + $0x90] sm:$0xff]  ;;  %v3630_v49 = vpack.c.bf16 %v2452_v38, %v2449_v29 }
 0x69d   :  { %3544 = vmatprep.subr.bf16.mxu0 %v3543_v56 }
 0x69f   :  { %3572 = vmatpush3.bf16.msra.mxu1 %v3571_v62 }
 0x6a0   :  { %3573 = vmatprep.subr.bf16.mxu1 %v3861_v0  ;;  %3546 = vmatpush1.bf16.msra.mxu0 %v3545_v50 }
 0x6a1   :  { %3548 = vmatprep.subr.bf16.mxu0 %v3547_v5 }
 0x6a3   :  { %3575 = vmatpush3.bf16.msra.mxu1 %v3574_v52 }
 0x6a4   :  { %3576 = vmatprep.subr.bf16.mxu1 %v3861_v0  ;;  %3550 = vmatpush1.bf16.msra.mxu0 %v3549_v39 }
 0x6a5   :  { %3552 = vmatprep.subr.bf16.mxu0 %v3551_v13 }
 0x6a7   :  { %3578 = vmatpush3.bf16.msra.mxu1 %v3577_v3 }
 0x6a8   :  { %3579 = vmatprep.subr.bf16.mxu1 %v3861_v0  ;;  %3554 = vmatpush1.bf16.msra.mxu0 %v3553_v15  ;;  %v2438_v15 = vld [vmem:[#allocation10 + $0x18] sm:$0xff] }
 0x6a9   :  { %3556 = vmatprep.subr.bf16.mxu0 %v3555_v8  ;;  %v2445_v8 = vld [vmem:[#allocation10 + $0x50] sm:$0xff] }
 0x6ab   :  { %3581 = vmatpush3.bf16.msra.mxu1 %v3580_v17  ;;  %v2442_v17 = vld [vmem:[#allocation10 + $0x38] sm:$0xff] }
 0x6ac   :  { %3582 = vmatprep.subr.bf16.mxu1 %v3861_v0  ;;  %3558 = vmatpush1.bf16.msra.mxu0 %v3557_v18  ;;  %v3593_v18 = vpack.c.bf16 %v2438_v15, %v2435_v4  ;;  %v3595_v34 = vpack.c.bf16 %v2445_v8, %v2442_v17  ;;  %v2474_v4 = vld [vmem:[#allocation10 + $0x138] sm:$0xff]  ;;  %v2473_v15 = vld [vmem:[#allocation10 + $0x130] sm:$0xff] }
 0x6ad   :  { %3560 = vmatprep.subr.bf16.mxu0 %v3559_v42  ;;  %v2443_v42 = vld [vmem:[#allocation10 + $0x40] sm:$0xff]  ;;  %v2477_v8 = vld [vmem:[#allocation10 + $0x150] sm:$0xff] }
 0x6ae   :  { %v3627_v24 = vpack.c.bf16 %v2446_v21, %v2443_v42 }
 0x6af   :  { %3584 = vmatpush3.bf16.msra.mxu1 %v3583_v20  ;;  %v2444_v20 = vld [vmem:[#allocation10 + $0x48] sm:$0xff] }
 0x6b0   :  { %3585 = vmatprep.subr.bf16.mxu1 %v3861_v0  ;;  %3562 = vmatpush1.bf16.msra.mxu0 %v3561_v40  ;;  %v2451_v40 = vld [vmem:[#allocation10 + $0x80] sm:$0xff]  ;;  %v3597_v23 = vpack.c.bf16 %v2444_v20, %v2441_v41  ;;  %v2482_v41 = vld [vmem:[#allocation10 + $0x178] sm:$0xff] }
 0x6b1   :  { %3564 = vmatprep.subr.bf16.mxu0 %v3563_v26  ;;  %v2450_v26 = vld [vmem:[#allocation10 + $0x78] sm:$0xff] }
 0x6b2   :  { %v3601_v44 = vpack.c.bf16 %v2450_v26, %v2447_v36  ;;  %v3711_v20 = vld [vmem:[#allocation5] sm:$0xff] }
 0x6b3   :  { %3587 = vmatpush3.bf16.msra.mxu1 %v3586_v25  ;;  %v3599_v25 = vpack.c.bf16 %v2451_v40, %v2448_v27  ;;  %v2254_v27 = vld [vmem:[%s4406_s5] sm:$0x7]  ;;  %s3865_s5 = smov [#allocation11]  }
 0x6b4   :  { %3588 = vmatprep.subr.bf16.mxu1 %v3861_v0  ;;  %3566 = vmatpush1.bf16.msra.mxu0 %v3565_v45  ;;  %v2457_v45 = vld [vmem:[#allocation10 + $0xb0] sm:$0xff]  ;;  %v2259_v40 = vrot.slane %v2254_v27, %v4001_v31 }
 0x6b5   :  { %3592 = vmatprep.subr.bf16.mxu0 %v3591_v57  ;;  %v2456_v57 = vld [vmem:[#allocation10 + $0xa8] sm:$0xff] }
 0x6b7   :  { %3590 = vmatpush3.bf16.msra.mxu1 %v3589_v54  ;;  %v3603_v54 = vpack.c.bf16 %v2457_v45, %v2454_v43 }
 0x6b8   :  { %3623 = vmatprep.subr.bf16.mxu1 %v3861_v0 }
 0x751   :  { %v1642_v35 = vpop.f32.mrb[8].mxu1 }
 0x752   :  { %v3213_v28 = vpop.f32.mrb[9].mxu1 }
 0x753   :  { %v2458_v28 = vld [vmem:[#allocation10 + $0xb8] sm:$0xff] }
 0x755   :  { %v1722_v53 = vpop.f32.mrb[10].mxu1 }
 0x756   :  { %v2279_v62 = vrot.slane %v1722_v53, 7  ;;  %v3218_v56 = vpop.f32.mrb[11].mxu1  ;;  %v2460_v53 = vld [vmem:[#allocation10 + $0xc8] sm:$0xff] }
 0x757   :  { %v3605_v56 = vpack.c.bf16 %v2456_v57, %v2453_v30 }
 0x758   :  { %v2280_v63 = vsel %vm1350_vm1, %v2279_v62, %v1642_v35  ;;  %v2455_v35 = vld [vmem:[#allocation10 + $0xa0] sm:$0xff] }
 0x759   :  { %v1802_v2 = vpop.f32.mrb[12].mxu1  ;;  %v2463_v62 = vld [vmem:[#allocation10 + $0xe0] sm:$0xff] }
 0x75a   :  { %v2281_v48 = vrot.slane %v1802_v2, 6  ;;  %v3223_v50 = vpop.f32.mrb[13].mxu1  ;;  %v3633_v2 = vpack.c.bf16 %v2458_v28, %v2455_v35 }
 0x75b   :  { %v2461_v50 = vld [vmem:[#allocation10 + $0xd0] sm:$0xff] }
 0x75c   :  { %v2282_v55 = vsel %vm1352_vm2, %v2281_v48, %v2280_v63  ;;  %v2459_v63 = vld [vmem:[#allocation10 + $0xc0] sm:$0xff]  ;;  %v2462_v48 = vld [vmem:[#allocation10 + $0xd8] sm:$0xff] }
 0x75d   :  { %v1882_v58 = vpop.f32.mrb[14].mxu1 }
 0x75e   :  { %v2283_v59 = vrot.slane %v1882_v58, 5  ;;  %v3228_v52 = vpop.f32.mrb[15].mxu1  ;;  %v2466_v58 = vld [vmem:[#allocation10 + $0xf8] sm:$0xff] }
 0x75f   :  { %v3609_v52 = vpack.c.bf16 %v2462_v48, %v2459_v63 }
 0x760   :  { %v2284_v5 = vsel %vm1354_vm3, %v2283_v59, %v2282_v55  ;;  %v2464_v55 = vld [vmem:[#allocation10 + $0xe8] sm:$0xff]  ;;  %v2469_v59 = vld [vmem:[#allocation10 + $0x110] sm:$0xff] }
 0x761   :  { %v1962_v7 = vpop.f32.mrb[16].mxu1 }
 0x762   :  { %v2285_v60 = vrot.slane %v1962_v7, 4  ;;  %v3233_v9 = vpop.f32.mrb[17].mxu1  ;;  %v3636_v7 = vpack.c.bf16 %v2464_v55, %v2461_v50 }
 0x763   :  { %v2468_v9 = vld [vmem:[#allocation10 + $0x108] sm:$0xff] }
 0x764   :  { %v2286_v39 = vsel %vm1356_vm4, %v2285_v60, %v2284_v5  ;;  %v2465_v5 = vld [vmem:[#allocation10 + $0xf0] sm:$0xff]  ;;  %v3611_v60 = vpack.c.bf16 %v2469_v59, %v2466_v58 }
 0x765   :  { %v2042_v61 = vpop.f32.mrb[18].mxu1 }
 0x766   :  { %v2287_v12 = vrot.slane %v2042_v61, 3  ;;  %v3238_v47 = vpop.f32.mrb[19].mxu1  ;;  %v2470_v61 = vld [vmem:[#allocation10 + $0x118] sm:$0xff] }
 0x767   :  { %v2475_v47 = vld [vmem:[#allocation10 + $0x140] sm:$0xff] }
 0x768   :  { %v2288_v3 = vsel %vm1358_vm5, %v2287_v12, %v2286_v39  ;;  %v2467_v39 = vld [vmem:[#allocation10 + $0x100] sm:$0xff]  ;;  %v2472_v12 = vld [vmem:[#allocation10 + $0x128] sm:$0xff] }
 0x769   :  { %v2122_v13 = vpop.f32.mrb[20].mxu1 }
 0x76a   :  { %v2289_v14 = vrot.slane %v2122_v13, 2  ;;  %v3243_v46 = vpop.f32.mrb[21].mxu1  ;;  %v2471_v13 = vld [vmem:[#allocation10 + $0x120] sm:$0xff] }
 0x76b   :  { %v3615_v46 = vpack.c.bf16 %v2475_v47, %v2472_v12  ;;  %v3617_v17 = vpack.c.bf16 %v2474_v4, %v2471_v13 }
 0x76c   :  { %v2290_v16 = vsel %vm1360_vm6, %v2289_v14, %v2288_v3  ;;  %v3613_v3 = vpack.c.bf16 %v2468_v9, %v2465_v5  ;;  %v3639_v14 = vpack.c.bf16 %v2470_v61, %v2467_v39 }
 0x76d   :  { %v2202_v10 = vpop.f32.mrb[22].mxu1 }
 0x76e   :  { %v2291_v11 = vrot.slane %v2202_v10, 1  ;;  %v3248_v33 = vpop.f32.mrb[23].mxu1  ;;  %v3642_v10 = vpack.c.bf16 %v2476_v51, %v2473_v15 }
 0x76f   :  { %v2480_v33 = vld [vmem:[#allocation10 + $0x168] sm:$0xff] }
 0x770   :  { %v2292_v22 = vsel %vm1362_vm7, %v2291_v11, %v2290_v16  ;;  %v2481_v16 = vld [vmem:[#allocation10 + $0x170] sm:$0xff] }
 0x771   :  { %2359 = vmatmul.mubr.f32.vlgmr.msra.gmra.mrb[10].mxu0 %v2292_v22  ;;  %2663 = vst [vmem:[#allocation11 + $0x8] sm:$0xff] %v2292_v22  ;;  %3282 = vmatmul.mubr.f32.vlgmr.msra.gmra.mrb[24].mxu1 %v2292_v22  ;;  %v3619_v11 = vpack.c.bf16 %v2481_v16, %v2478_v6  ;;  %v2483_v22 = vld [vmem:[%s4407_s6] sm:$0x7]  ;;  %s2670_s6 = sshll.u32 %s3865_s5, 4  ;;  %s2671_s6 = int_to_ptr.vmem [resolvable:$true] %s2670_s6 }
 0x772   :  { %3594 = vmatpush1.bf16.msra.mxu0 %v3593_v18  ;;  %3625 = vmatpush3.bf16.msra.mxu1 %v3624_v19  ;;  %v2479_v18 = vld [vmem:[#allocation10 + $0x160] sm:$0xff]  ;;  %v3621_v19 = vpack.c.bf16 %v2480_v33, %v2477_v8  ;;  %v2492_v36 = vrot.slane %v2483_v22, %v4004_v32  ;;  %s3822_s16 = scalar_lea.vmem %s2671_s6, 256  ;;  %p3827_p13 = scmp.lt.s32.totalorder %s2671_s6, %s2671_s6 }
 0x773   :  { %3596 = vmatprep.subr.bf16.mxu0 %v3595_v34  ;;  %3626 = vmatprep.subr.bf16.mxu1 %v3861_v0  ;;  %v3645_v34 = vpack.c.bf16 %v2482_v41, %v2479_v18  ;;  %p3823_p12 = scmp.ne.s32.totalorder %s2671_s6, %s3822_s16  ;;  %p3828_p0 = scmp.lt.s32.totalorder %s3822_s16, %s3822_s16 }
 0x774   :  { %2564 = vmatprep.mubr.f32.mxu0 %v3863_v1  ;;  %3316 = vmatprep.mubr.msk.f32.mxu1 %vm3862_vm0, %v3863_v1  ;;  %v3607_v1 = vpack.c.bf16 %v2463_v62, %v2460_v53 }
 0x775   :  { %p3829_p1 = por %p3828_p0, %p3827_p13 }
 0x776   :  { %3598 = vmatpush1.bf16.msra.mxu0 %v3597_v23  ;;  %3628 = vmatpush3.bf16.msra.mxu1 %v3627_v24  ;;  %v2488_v23 = vrot.slane %v2483_v22, %v4001_v31  ;;  %v2496_v31 = vrot.slane %v2483_v22, %v4013_v37 }
 0x777   :  { %3600 = vmatprep.subr.bf16.mxu0 %v3599_v25  ;;  %3629 = vmatprep.subr.bf16.mxu1 %v3861_v0  ;;  %p3830_p2 = pnand %p3829_p1, %p3823_p12 }
 0x778   :  { %v3647_v24 = vadd.f32 %v2488_v23, %v2259_v40 }
 0x77a   :  { %3602 = vmatpush1.bf16.msra.mxu0 %v3601_v44  ;;  %3631 = vmatpush3.bf16.msra.mxu1 %v3630_v49 }
 0x77b   :  { %3604 = vmatprep.subr.bf16.mxu0 %v3603_v54  ;;  %3632 = vmatprep.subr.bf16.mxu1 %v3861_v0 }
 0x77e   :  { %3606 = vmatpush1.bf16.msra.mxu0 %v3605_v56  ;;  %3634 = vmatpush3.bf16.msra.mxu1 %v3633_v2 }
 0x77f   :  { %3608 = vmatprep.subr.bf16.mxu0 %v3607_v1  ;;  %3635 = vmatprep.subr.bf16.mxu1 %v3861_v0 }
 0x782   :  { %3610 = vmatpush1.bf16.msra.mxu0 %v3609_v52  ;;  %3637 = vmatpush3.bf16.msra.mxu1 %v3636_v7 }
 0x783   :  { %3612 = vmatprep.subr.bf16.mxu0 %v3611_v60  ;;  %3638 = vmatprep.subr.bf16.mxu1 %v3861_v0 }
 0x786   :  { %3614 = vmatpush1.bf16.msra.mxu0 %v3613_v3  ;;  %3640 = vmatpush3.bf16.msra.mxu1 %v3639_v14 }
 0x787   :  { %3616 = vmatprep.subr.bf16.mxu0 %v3615_v46  ;;  %3641 = vmatprep.subr.bf16.mxu1 %v3861_v0 }
 0x78a   :  { %3618 = vmatpush1.bf16.msra.mxu0 %v3617_v17  ;;  %3643 = vmatpush3.bf16.msra.mxu1 %v3642_v10 }
 0x78b   :  { %3620 = vmatprep.subr.bf16.mxu0 %v3619_v11  ;;  %3644 = vmatprep.subr.bf16.mxu1 %v3861_v0  ;;  %v2263_v0 = vrot.slane %v2254_v27, %v4004_v32  ;;  %v2267_v32 = vrot.slane %v2254_v27, %v4013_v37 }
 0x78d   :  { %v3649_v26 = vadd.f32 %v2492_v36, %v2263_v0 }
 0x78e   :  { %3622 = vmatpush1.bf16.msra.mxu0 %v3621_v19  ;;  %3646 = vmatpush3.bf16.msra.mxu1 %v3645_v34 }
 0x791   :  { %2565 = vmatmul.mubr.f32.vlgmr.msra.gmra.mrb[10].mxu0 %v3711_v20  ;;  %3317 = vmatmul.mubr.f32.vlgmr.msra.gmra.mrb[26].mxu1 %v3711_v20 }
 0x844   :  { %v2431_v42 = vpop.f32.mrb[24].mxu1 }
 0x845   :  { %v3283_v21 = vpop.f32.mrb[25].mxu1  ;;  %v2432_v56 = vadd.f32 %v2431_v42, %v2267_v32 }
 0x864   :  { %v2566_v25 = vpop.f32.mrb[10].mxu0  ;;  %v2637_v29 = vpop.f32.mrb[26].mxu1 }
 0x865   :  { %v3648_v38 = vadd.f32 %v3647_v24, %v2566_v25  ;;  %v2568_v43 = vpop.f32.mrb[11].mxu0  ;;  %v3318_v45 = vpop.f32.mrb[27].mxu1  ;;  %v2638_v53 = vadd.f32 %v2637_v29, %v2496_v31 }
 0x866   :  { %v3650_v30 = vadd.f32 %v3649_v26, %v2568_v43 }
 0x867   :  { %v2689_v44 = vmul.f32 -1.442695, %v3648_v38 }
 0x868   :  { %v2690_v49 = vmul.f32 -1.442695, %v3650_v30 }
 0x869   :  { %3701 = vpow2.f32 %v2689_v44 }
 0x86a   :  { %3703 = vpow2.f32 %v2690_v49 }
 0x873   :  { %v3702_v54 = vpop.eup %3701 }
 0x874   :  { %v2645_v57 = vadd.f32 1.0, %v3702_v54  ;;  %v3704_v35 = vpop.eup %3703 }
 0x875   :  { %v2652_v28 = vadd.f32 1.0, %v3704_v35 }
 0x876   :  { %3705 = vrcp.f32 %v2645_v57 }
 0x877   :  { %3707 = vrcp.f32 %v2652_v28 }
 0x880   :  { %v3706_v62 = vpop.eup %3705 }
 0x881   :  { %v2655_v63 = vmul.f32 %v3706_v62, %v2638_v53  ;;  %v3708_v1 = vpop.eup %3707 }
 0x882   :  { %v2658_v48 = vsub.f32 1.0, %v3708_v1  ;;  %v2660_v58 = vmul.f32 %v3711_v20, %v3708_v1 }
 0x883   :  { %v2656_v2 = vadd.f32 %v2655_v63, %v2432_v56 }
 0x885   :  { %3709 = vtanh.f32 %v2656_v2 }
 0x88f   :  { %v3710_v50 = vpop.eup %3709 }
 0x890   :  { %v2659_v55 = vmul.f32 %v3710_v50, %v2658_v48 }
 0x892   :  { %v2661_v59 = vadd.f32 %v2660_v58, %v2659_v55 }
 0x894   :  { %2662 = vst [vmem:[#allocation11] sm:$0xff] %v2661_v59 }
 0x895   :  { %3833 = shalt.err (!%p3830_p2)
}
 0x896   :  { %s3834_s19 = scalar_lea.hbm %s4408_s7, 256 }
 0x897   :  { %p3835_p3 = scmp.ne.s32.totalorder %s4408_s7, %s3834_s19  ;;  %p3838_p4 = scmp.lt.u32.totalorder %s3834_s19, %s4408_s7 }
 0x899   :  { %p3840_p5 = pnand %p3838_p4, %p3835_p3 }
 0x89b   :  { %3843 = shalt.err (!%p3840_p5)
}
 0x89c   :  { %2673 = dma.vmem_to_hbm [thread:$0]  %s2671_s6, 256, %s4408_s7, [#allocation4]  }
 0x89d   :  { %3850 = dma.done.wait [#allocation4], 256  }
 0x89e   :  { %3851 = vsyncadd [#allocation4], 4294967040 }
 0x89f   :  { %2677 = vsyncpa [#allocation3], 1 }
 0x8a0   :  { %2678 = vsyncpa [#allocation6], 1 }
 0x8a1   :  { %2679 = vsyncpa [#allocation9], 1 }
 0x8a2   :  { %2680 = vsyncpa [#allocation4], 1 }

</bundles_post_ra>
